<compile_context>
chip_gen: v7x
topology: tpu7x:2x2x1
jax: 0.10.0
libtpu: 0.0.40
codegen_flags: <defaults>
</compile_context>

<pallas_src>
import functools

import jax
import jax.numpy as jnp
from jax import lax
from jax.experimental import pallas as pl
from jax.experimental.pallas import tpu as pltpu

NEG_INF = -1.0e30   # finite "-inf": keeps exp()/max() NaN-free on padded lanes


def _clip_partial_lse_kernel(scale_ref, img_ref, txt_ref, row_out_ref, col_out_ref,
                             *, n_valid, tm, tn, mask_rows, mask_cols):
    # (tm, d) @ (d, tn) on the MXU in the input dtype, f32 accumulation.  Text
    # is pre-transposed in the wrapper, so this is a plain (M,K)@(K,N) feed.
    # logit_scale multiplies the f32 logits (cheaper than re-scaling the
    # (tm, d) image tile every inner step; keeps the temperature in f32).
    logits = lax.dot_general(
        img_ref[...], txt_ref[...],
        dimension_numbers=(((1,), (0,)), ((), ())),
        preferred_element_type=jnp.float32,
    ) * scale_ref[0, 0]                                      # (tm, tn) f32

    # ---- image -> text direction: per-row partial LSE over this column tile.
    if mask_cols:
        col_ids = pl.program_id(1) * tn + lax.broadcasted_iota(jnp.int32, (1, tn), 1)
        logits_r = jnp.where(col_ids < n_valid, logits, NEG_INF)
    else:
        logits_r = logits
    rmax = jnp.max(logits_r, axis=1, keepdims=True)           # (tm, 1)
    rsum = jnp.sum(jnp.exp(logits_r - rmax), axis=1, keepdims=True)
    row_out_ref[...] = (rmax + jnp.log(rsum)).reshape(1, tm, 1)

    # ---- text -> image direction: per-column partial LSE over this row tile.
    # Second tile exp, stabilized by the tile's own per-column max: this makes
    # the column path robust for arbitrary logit ranges (review's
    # underflow-to--inf concern).  EUP load doubles; MXU still dominates for
    # D >~ 1k and correctness wins below that.
    if mask_rows:
        row_ids = pl.program_id(0) * tm + lax.broadcasted_iota(jnp.int32, (tm, 1), 0)
        logits_c = jnp.where(row_ids < n_valid, logits, NEG_INF)
    else:
        logits_c = logits
    cmax = jnp.max(logits_c, axis=0, keepdims=True)           # (1, tn)
    csum = jnp.sum(jnp.exp(logits_c - cmax), axis=0, keepdims=True)
    col_out_ref[...] = (cmax + jnp.log(csum)).reshape(1, 1, tn)


def _round_up(x, m):
    return pl.cdiv(x, m) * m


def _vmem_limit_bytes():
    """Generation-aware scoped-VMEM limit: ~96 MiB on 128-MiB chips (v5e/v6e),
    ~32 MiB on v7x (64 MiB physical)."""
    try:
        phys = int(pltpu.get_tpu_info().vmem_capacity_bytes)
    except Exception:
        phys = 64 * 1024 * 1024           # conservative fallback (v7x-sized)
    return max(32 * 1024 * 1024, min(96 * 1024 * 1024, phys - 32 * 1024 * 1024))


def _pick_tiles(n, d_pad, itemsize, vmem_limit):
    """Pick (tm, tn): the tallest image tile that fits the VMEM budget (per-step
    arithmetic intensity ~ 2*tm/itemsize flops per streamed text byte) with a
    narrow, lane-aligned text tile."""
    n128 = _round_up(n, 128)
    budget = int(vmem_limit * 0.6)        # slack for compiler temporaries

    def vmem_use(tm, tn):
        img = tm * d_pad * itemsize * 2           # image tile, double-buffered
        txt = tn * d_pad * itemsize * 2           # streamed text tile, double-buffered
        f32_tmp = 5 * tm * tn * 4                 # logits + masked copies + 2 exp tiles
        outs = (tm * 128 + 8 * tn) * 4 * 2        # lane/sublane-padded partial-LSE blocks
        return img + txt + f32_tmp + outs

    for tm in (2048, 1024, 512, 256, 128):        # prefer tall tm (sets AI)
        if tm > n128 and tm != 128:
            continue
        for tn in (256, 128):
            if tn > n128 and tn != 128:
                continue
            if vmem_use(tm, tn) <= budget:
                return tm, tn
    return 128, 128


def clip_loss(image_features, text_features, logit_scale, *, tm=None, tn=None):
    """ClipLoss.forward (world_size=1). features: [N, D]; returns scalar f32."""
    n, d = image_features.shape
    assert text_features.shape == (n, d)

    itemsize = jnp.dtype(image_features.dtype).itemsize
    d_pad = _round_up(d, 128)                 # lane-align the contraction dim
    vmem_limit = _vmem_limit_bytes()
    tm_auto, tn_auto = _pick_tiles(n, d_pad, itemsize, vmem_limit)
    tm = tm_auto if tm is None else tm
    tn = tn_auto if tn is None else tn

    n_pad_r = _round_up(n, tm)
    n_pad_c = _round_up(n, tn)
    mask_rows = n_pad_r != n                  # masks are compile-time no-ops for aligned N
    mask_cols = n_pad_c != n
    nr, nc = n_pad_r // tm, n_pad_c // tn

    img = image_features
    if (n_pad_r - n) or (d_pad - d):
        img = jnp.pad(img, ((0, n_pad_r - n), (0, d_pad - d)))
    txt = text_features
    if (n_pad_c - n) or (d_pad - d):
        txt = jnp.pad(txt, ((0, n_pad_c - n), (0, d_pad - d)))
    txt_t = txt.T                             # (d_pad, n_pad_c): one-time layout pass
    scale_arr = jnp.asarray(logit_scale, jnp.float32).reshape(1, 1)

    kernel = functools.partial(
        _clip_partial_lse_kernel, n_valid=n, tm=tm, tn=tn,
        mask_rows=mask_rows, mask_cols=mask_cols)

    cost = pl.CostEstimate(
        flops=int(2 * n_pad_r * n_pad_c * d_pad),
        transcendentals=int(2 * n_pad_r * n_pad_c),
        bytes_accessed=int((n_pad_r * d_pad + nr * n_pad_c * d_pad) * itemsize
                           + (nc * n_pad_r + nr * n_pad_c) * 4),
    )

    row_part, col_part = pl.pallas_call(
        kernel,
        out_shape=(jax.ShapeDtypeStruct((nc, n_pad_r, 1), jnp.float32),
                   jax.ShapeDtypeStruct((nr, 1, n_pad_c), jnp.float32)),
        grid_spec=pltpu.PrefetchScalarGridSpec(
            num_scalar_prefetch=0,
            grid=(nr, nc),                    # i = image-row tile, j = text tile
            in_specs=[
                pl.BlockSpec(memory_space=pltpu.SMEM),               # logit_scale
                pl.BlockSpec((tm, d_pad), lambda i, j: (i, 0)),      # image tile (resident over j)
                pl.BlockSpec((d_pad, tn), lambda i, j: (0, j)),      # streamed text tile
                # TODO(synk): pipeline_mode=pl.Buffered(3) on the text spec if
                # profiling shows exposed DMA for small D (<= 512).
            ],
            out_specs=(
                pl.BlockSpec((1, tm, 1), lambda i, j: (j, i, 0)),    # per-row partial LSE
                pl.BlockSpec((1, 1, tn), lambda i, j: (i, 0, j)),    # per-col partial LSE
            )),
        compiler_params=pltpu.CompilerParams(
            # No cross-tile carried state -> both grid axes are parallel, so v7x
            # megacore splits the grid over its two TensorCores for free.
            dimension_semantics=("parallel", "parallel"),
            vmem_limit_bytes=vmem_limit,
        ),
        cost_estimate=cost,
    )(scale_arr, img, txt_t)

    # Tiny JAX epilogue: merge per-tile partial LSEs and subtract the trace.
    lse_rows = jax.nn.logsumexp(row_part[:, :n, 0], axis=0)           # (n,)
    lse_cols = jax.nn.logsumexp(col_part[:, 0, :n], axis=0)           # (n,)
    img32 = image_features.astype(jnp.float32)
    txt32 = text_features.astype(jnp.float32)
    trace = jnp.asarray(logit_scale, jnp.float32) * jnp.sum(img32 * txt32)
    return (jnp.sum(lse_rows) + jnp.sum(lse_cols) - 2.0 * trace) / (2.0 * n)


def clip_loss_ref(image_features, text_features, logit_scale):
    """Pure-JAX reference mirroring PyTorch ClipLoss.forward (world_size=1)."""
    img = image_features.astype(jnp.float32)
    txt = text_features.astype(jnp.float32)
    logits_per_image = logit_scale * jnp.dot(img, txt.T,
                                             precision=lax.Precision.HIGHEST)
    logits_per_text = logits_per_image.T
    labels = jnp.arange(img.shape[0])

    def ce(logits):
        lse = jax.nn.logsumexp(logits, axis=-1)
        true = jnp.take_along_axis(logits, labels[:, None], axis=-1)[:, 0]
        return jnp.mean(lse - true)

    return 0.5 * (ce(logits_per_image) + ce(logits_per_text))


if __name__ == "__main__":
    key = jax.random.PRNGKey(0)

    def make(n, d, dtype, k):
        ki, kt = jax.random.split(k)
        img = jax.random.normal(ki, (n, d), jnp.float32)
        txt = jax.random.normal(kt, (n, d), jnp.float32)
        img = img / jnp.linalg.norm(img, axis=-1, keepdims=True)
        txt = txt / jnp.linalg.norm(txt, axis=-1, keepdims=True)
        return img.astype(dtype), txt.astype(dtype)

    cases = [
        # (name,                N,   D,  dtype,         tm,   tn,   scale,     tol)
        ("f32 aligned",        256, 128, jnp.float32,   None, None, 1.0 / 0.07, 2e-2),
        ("f32 padded/masked",  200,  96, jnp.float32,   None, None, 1.0 / 0.07, 2e-2),
        ("bf16 mxu path",      256, 128, jnp.bfloat16,  None, None, 1.0 / 0.07, 3e-2),
        ("rect tiles + grid",  384, 128, jnp.float32,   256,  128,  30.0,       5e-2),
    ]
    keys = jax.random.split(key, len(cases))
    for (name, n, d, dtype, tm, tn, scale, tol), k in zip(cases, keys):
        img, txt = make(n, d, dtype, k)
        got = clip_loss(img, txt, jnp.float32(scale), tm=tm, tn=tn)
        jax.block_until_ready(got)
        want = clip_loss_ref(img, txt, jnp.float32(scale))
        assert jnp.allclose(got, want, atol=tol, rtol=tol), (name, got, want)

    # TODO(synk): world_size > 1 gather_features path (distributed all-gather,
    # local_loss/mask variants, label caching) not modeled; this is the
    # single-device forward.
    print("KERNEL_OK")
</pallas_src>

<mosaic_0001>
module attributes {stable_mosaic.version = 11 : i64} {
  func.func @_clip_partial_lse_kernel(%arg0: i32, %arg1: i32, %arg2: memref<1x1xf32, #tpu.memory_space<smem>>, %arg3: memref<256x128xf32, #tpu.memory_space<vmem>>, %arg4: memref<128x256xf32, #tpu.memory_space<vmem>>, %arg5: memref<1x256x1xf32, #tpu.memory_space<vmem>>, %arg6: memref<1x1x256xf32, #tpu.memory_space<vmem>>) attributes {dimension_semantics = [#tpu.dimension_semantics<parallel>, #tpu.dimension_semantics<parallel>], iteration_bounds = array<i64: 1, 1>, scalar_prefetch = 0 : i64, scratch_operands = 0 : i64, tpu.core_type = #tpu.core_type<tc>, window_params = [{transform_indices = @transform_0, window_bounds = array<i64: 1, 1>}, {transform_indices = @transform_1, window_bounds = array<i64: 256, 128>}, {transform_indices = @transform_2, window_bounds = array<i64: 128, 256>}, {transform_indices = @transform_3, window_bounds = array<i64: 1, 256, 1>}, {transform_indices = @transform_4, window_bounds = array<i64: 1, 1, 256>}]} {
    %c0 = arith.constant 0 : index
    %c0_0 = arith.constant 0 : index
    %0 = vector.load %arg3[%c0, %c0_0] : memref<256x128xf32, #tpu.memory_space<vmem>>, vector<256x128xf32>
    %c0_1 = arith.constant 0 : index
    %c0_2 = arith.constant 0 : index
    %1 = vector.load %arg4[%c0_1, %c0_2] : memref<128x256xf32, #tpu.memory_space<vmem>>, vector<128x256xf32>
    %cst = arith.constant dense<0.000000e+00> : vector<256x256xf32>
    %2 = tpu.matmul %0, %1, %cst {dimension_numbers = #tpu.dot_dimension_numbers<[1], [0], [0], [1], [0, 0, 1, 1], [], []>} : vector<256x128xf32>, vector<128x256xf32>, vector<256x256xf32> -> vector<256x256xf32>
    %c0_3 = arith.constant 0 : index
    %c0_4 = arith.constant 0 : index
    %3 = memref.load %arg2[%c0_3, %c0_4] : memref<1x1xf32, #tpu.memory_space<smem>>
    %4 = vector.broadcast %3 : f32 to vector<256x256xf32>
    %5 = arith.mulf %2, %4 : vector<256x256xf32>
    %cst_5 = arith.constant dense<0xFF800000> : vector<256xf32>
    %6 = vector.multi_reduction <maximumf>, %5, %cst_5 [1] : vector<256x256xf32> to vector<256xf32>
    %7 = vector.shape_cast %6 : vector<256xf32> to vector<256x1xf32>
    %8 = vector.broadcast %7 : vector<256x1xf32> to vector<256x256xf32>
    %9 = arith.subf %5, %8 : vector<256x256xf32>
    %10 = math.exp %9 : vector<256x256xf32>
    %cst_6 = arith.constant dense<0.000000e+00> : vector<256xf32>
    %11 = vector.multi_reduction <add>, %10, %cst_6 [1] : vector<256x256xf32> to vector<256xf32>
    %12 = vector.shape_cast %11 : vector<256xf32> to vector<256x1xf32>
    %13 = math.log %12 : vector<256x1xf32>
    %14 = arith.addf %7, %13 : vector<256x1xf32>
    %15 = vector.shape_cast %14 : vector<256x1xf32> to vector<1x256x1xf32>
    %c0_7 = arith.constant 0 : index
    %c0_8 = arith.constant 0 : index
    %c0_9 = arith.constant 0 : index
    %16 = vector.load %arg5[%c0_7, %c0_8, %c0_9] : memref<1x256x1xf32, #tpu.memory_space<vmem>>, vector<1x256x1xf32>
    tpu.vector_store %arg5[%c0_7, %c0_8, %c0_9], %15 {strides = array<i32>} : memref<1x256x1xf32, #tpu.memory_space<vmem>>, vector<1x256x1xf32>,
    %cst_10 = arith.constant dense<0xFF800000> : vector<256xf32>
    %17 = vector.multi_reduction <maximumf>, %5, %cst_10 [0] : vector<256x256xf32> to vector<256xf32>
    %18 = vector.shape_cast %17 : vector<256xf32> to vector<1x256xf32>
    %19 = vector.broadcast %18 : vector<1x256xf32> to vector<256x256xf32>
    %20 = arith.subf %5, %19 : vector<256x256xf32>
    %21 = math.exp %20 : vector<256x256xf32>
    %cst_11 = arith.constant dense<0.000000e+00> : vector<256xf32>
    %22 = vector.multi_reduction <add>, %21, %cst_11 [0] : vector<256x256xf32> to vector<256xf32>
    %23 = vector.shape_cast %22 : vector<256xf32> to vector<1x256xf32>
    %24 = math.log %23 : vector<1x256xf32>
    %25 = arith.addf %18, %24 : vector<1x256xf32>
    %26 = vector.shape_cast %25 : vector<1x256xf32> to vector<1x1x256xf32>
    %c0_12 = arith.constant 0 : index
    %c0_13 = arith.constant 0 : index
    %c0_14 = arith.constant 0 : index
    %27 = vector.load %arg6[%c0_12, %c0_13, %c0_14] : memref<1x1x256xf32, #tpu.memory_space<vmem>>, vector<1x1x256xf32>
    tpu.vector_store %arg6[%c0_12, %c0_13, %c0_14], %26 {strides = array<i32>} : memref<1x1x256xf32, #tpu.memory_space<vmem>>, vector<1x1x256xf32>,
    return
  }
  func.func @transform_0(%arg0: i32, %arg1: i32) -> (i32, i32) {
    %c0_i32 = arith.constant 0 : i32
    %c0_i32_0 = arith.constant 0 : i32
    %c0_i32_1 = arith.constant 0 : i32
    return %c0_i32, %c0_i32_0 : i32, i32
  }
  func.func @transform_1(%arg0: i32, %arg1: i32) -> (i32, i32) {
    %c0_i32 = arith.constant 0 : i32
    %c0_i32_0 = arith.constant 0 : i32
    return %arg0, %c0_i32 : i32, i32
  }
  func.func @transform_2(%arg0: i32, %arg1: i32) -> (i32, i32) {
    %c0_i32 = arith.constant 0 : i32
    %c0_i32_0 = arith.constant 0 : i32
    return %c0_i32, %arg1 : i32, i32
  }
  func.func @transform_3(%arg0: i32, %arg1: i32) -> (i32, i32, i32) {
    %c0_i32 = arith.constant 0 : i32
    %c0_i32_0 = arith.constant 0 : i32
    return %arg1, %arg0, %c0_i32 : i32, i32, i32
  }
  func.func @transform_4(%arg0: i32, %arg1: i32) -> (i32, i32, i32) {
    %c0_i32 = arith.constant 0 : i32
    %c0_i32_0 = arith.constant 0 : i32
    return %arg0, %c0_i32, %arg1 : i32, i32, i32
  }
}

</mosaic_0001>

<bundles_post_ra>
// kernel: tpu_custom_call.1
= control target key start
LH: loop header
LB: loop body
LE: loop exit
PB: predicated region body
PF: predicated region fallthrough
CT: control target
= control target key end

     0   :  { %11 = vsyncpa [#allocation4], 0  ;;  %s2823_s0 = inlined_call_operand.<no memory space> [shape: f32[1,1], index: 0, kind: input, shape index: {}]   ;;  %s2824_s1 = inlined_call_operand.hbm [shape: f32[256,128], index: 1, kind: input, shape index: {}]   ;;  %s2825_s2 = inlined_call_operand.hbm [shape: f32[128,256], index: 2, kind: input, shape index: {}]   ;;  %s2826_s3 = inlined_call_operand.vmem [shape: f32[1,256,1], index: 3, kind: output, shape index: {0}]   ;;  %s2827_s4 = inlined_call_operand.hbm [shape: f32[1,1,256], index: 4, kind: output, shape index: {1}]  }
   0x1   :  { %12 = vsyncpa [#allocation7], 0 }
   0x2   :  { %13 = vsyncpa [#allocation5], 0  ;;  %s1788_s15 = smov [#allocation3]   ;;  %s1716_s19 = scalar_lea.hbm %s2824_s1, 4096 }
   0x3   :  { %s21_s16 = sshll.u32 %s1788_s15, 4  ;;  %p1717_p0 = scmp.ne.s32.totalorder %s2824_s1, %s1716_s19  ;;  %s22_s16 = int_to_ptr.vmem [resolvable:$true] %s21_s16 }
   0x4   :  { %p1720_p1 = scmp.lt.u32.totalorder %s1716_s19, %s2824_s1 }
   0x6   :  { %p1722_p2 = pnand %p1720_p1, %p1717_p0 }
   0x8   :  { %1725 = shalt.err (!%p1722_p2)
}
   0x9   :  { %s1726_s24 = scalar_lea.vmem %s22_s16, 4096  ;;  %p1731_p4 = scmp.lt.s32.totalorder %s22_s16, %s22_s16 }
   0xa   :  { %p1727_p3 = scmp.ne.s32.totalorder %s22_s16, %s1726_s24  ;;  %p1732_p5 = scmp.lt.s32.totalorder %s1726_s24, %s1726_s24 }
   0xc   :  { %p1733_p6 = por %p1732_p5, %p1731_p4 }
   0xe   :  { %p1734_p7 = pnand %p1733_p6, %p1727_p3 }
  0x10   :  { %1737 = shalt.err (!%p1734_p7)
}
  0x11   :  { %s1789_s25 = smov 128   ;;  %s1790_s26 = smov 8  }
  0x12   :  { %27 = dma.hbm_to_vmem [thread:$0]  %s2824_s1, 4096, %s22_s16, [#allocation4], %s1789_s25, %s1789_s25, %s1790_s26  }
  0x13   :  { %s1791_s29 = smov [#allocation6]   ;;  %s1738_s7 = scalar_lea.hbm %s2825_s2, 4096 }
  0x14   :  { %s33_s30 = sshll.u32 %s1791_s29, 4  ;;  %p1739_p8 = scmp.ne.s32.totalorder %s2825_s2, %s1738_s7  ;;  %s34_s30 = int_to_ptr.vmem [resolvable:$true] %s33_s30 }
  0x15   :  { %p1742_p9 = scmp.lt.u32.totalorder %s1738_s7, %s2825_s2 }
  0x17   :  { %p1744_p10 = pnand %p1742_p9, %p1739_p8 }
  0x19   :  { %1747 = shalt.err (!%p1744_p10)
}
  0x1a   :  { %s1748_s12 = scalar_lea.vmem %s34_s30, 4096  ;;  %p1753_p12 = scmp.lt.s32.totalorder %s34_s30, %s34_s30 }
  0x1b   :  { %p1749_p11 = scmp.ne.s32.totalorder %s34_s30, %s1748_s12  ;;  %p1754_p13 = scmp.lt.s32.totalorder %s1748_s12, %s1748_s12 }
  0x1d   :  { %p1755_p0 = por %p1754_p13, %p1753_p12 }
  0x1f   :  { %p1756_p1 = pnand %p1755_p0, %p1749_p11 }
  0x21   :  { %1759 = shalt.err (!%p1756_p1)
}
  0x22   :  { %s1792_s1 = smov 256   ;;  %s1793_s13 = smov 16  }
  0x23   :  { %39 = dma.hbm_to_vmem [thread:$0]  %s2825_s2, 4096, %s34_s30, [#allocation7], %s1792_s1, %s1792_s1, %s1793_s13  }
  0x24   :  { %1782 = dma.done.wait [#allocation4], 4096  }
  0x25   :  { %1783 = vsyncadd [#allocation4], 4294963200 }
  0x26   :  { %1784 = dma.done.wait [#allocation7], 4096  }
  0x27   :  { %1785 = vsyncadd [#allocation7], 4294963200  ;;  %v1794_v0 = vmov 0.0   ;;  %v79_v1 = vld [vmem:[#allocation6 + $0x8] sm:$0xff]  ;;  %v81_v2 = vld [vmem:[#allocation6 + $0x18] sm:$0xff] }
  0x28   :  { %174 = vmatprep.mubr.f32.mxu0 %v1794_v0  ;;  %270 = vmatprep.mubr.f32.mxu1 %v1794_v0  ;;  %v78_v3 = vld [vmem:[#allocation6] sm:$0xff]  ;;  %v1335_v4 = vpack.c.bf16 %v81_v2, %v79_v1  ;;  %v80_v5 = vld [vmem:[#allocation6 + $0x10] sm:$0xff]  ;;  %v83_v6 = vld [vmem:[#allocation6 + $0x28] sm:$0xff] }
  0x29   :  { %v85_v7 = vld [vmem:[#allocation6 + $0x38] sm:$0xff]  ;;  %v1337_v8 = vpack.c.bf16 %v80_v5, %v78_v3  ;;  %v82_v10 = vld [vmem:[#allocation6 + $0x20] sm:$0xff]  ;;  %v84_v11 = vld [vmem:[#allocation6 + $0x30] sm:$0xff] }
  0x2a   :  { %v1339_v9 = vpack.c.bf16 %v85_v7, %v83_v6  ;;  %v87_v12 = vld [vmem:[#allocation6 + $0x48] sm:$0xff]  ;;  %1336 = vmatprep.subr.bf16.mxu0 %v1335_v4  ;;  %1367 = vmatprep.subr.bf16.mxu1 %v1335_v4  ;;  %v89_v13 = vld [vmem:[#allocation6 + $0x58] sm:$0xff]  ;;  %v1341_v14 = vpack.c.bf16 %v84_v11, %v82_v10  ;;  %v86_v16 = vld [vmem:[#allocation6 + $0x40] sm:$0xff] }
  0x2b   :  { %1338 = vmatpush1.bf16.msra.mxu0 %v1337_v8  ;;  %1375 = vmatpush1.bf16.msra.mxu1 %v1337_v8  ;;  %v1343_v15 = vpack.c.bf16 %v89_v13, %v87_v12  ;;  %v88_v17 = vld [vmem:[#allocation6 + $0x50] sm:$0xff]  ;;  %v91_v18 = vld [vmem:[#allocation6 + $0x68] sm:$0xff]  ;;  %v93_v19 = vld [vmem:[#allocation6 + $0x78] sm:$0xff] }
  0x2c   :  { %1340 = vmatprep.subr.bf16.mxu0 %v1339_v9  ;;  %1368 = vmatprep.subr.bf16.mxu1 %v1339_v9  ;;  %v1345_v20 = vpack.c.bf16 %v88_v17, %v86_v16  ;;  %v1347_v21 = vpack.c.bf16 %v93_v19, %v91_v18  ;;  %v90_v22 = vld [vmem:[#allocation6 + $0x60] sm:$0xff]  ;;  %v92_v23 = vld [vmem:[#allocation6 + $0x70] sm:$0xff]  ;;  %v95_v24 = vld [vmem:[#allocation6 + $0x88] sm:$0xff]  ;;  %v1881_v18 = vstv %s2823_s0  ;;  %s1796_s0 = smov [#allocation8]  }
  0x2d   :  { %v97_v25 = vld [vmem:[#allocation6 + $0x98] sm:$0xff]  ;;  %v1349_v26 = vpack.c.bf16 %v92_v23, %v90_v22  ;;  %v94_v28 = vld [vmem:[#allocation6 + $0x80] sm:$0xff]  ;;  %v96_v29 = vld [vmem:[#allocation6 + $0x90] sm:$0xff]  ;;  %s1323_s17 = sshll.u32 %s1796_s0, 4  ;;  %s1324_s17 = int_to_ptr.vmem [resolvable:$true] %s1323_s17 }
  0x2e   :  { %v1351_v27 = vpack.c.bf16 %v97_v25, %v95_v24  ;;  %v99_v30 = vld [vmem:[#allocation6 + $0xa8] sm:$0xff]  ;;  %v101_v31 = vld [vmem:[#allocation6 + $0xb8] sm:$0xff]  ;;  %v1353_v32 = vpack.c.bf16 %v96_v29, %v94_v28  ;;  %v98_v34 = vld [vmem:[#allocation6 + $0xa0] sm:$0xff]  ;;  %s1760_s18 = scalar_lea.vmem %s1324_s17, 32  ;;  %p1765_p3 = scmp.lt.s32.totalorder %s1324_s17, %s1324_s17 }
  0x2f   :  { %1342 = vmatpush1.bf16.msra.mxu0 %v1341_v14  ;;  %1376 = vmatpush1.bf16.msra.mxu1 %v1341_v14  ;;  %v1355_v33 = vpack.c.bf16 %v101_v31, %v99_v30  ;;  %v100_v35 = vld [vmem:[#allocation6 + $0xb0] sm:$0xff]  ;;  %v103_v36 = vld [vmem:[#allocation6 + $0xc8] sm:$0xff]  ;;  %v105_v37 = vld [vmem:[#allocation6 + $0xd8] sm:$0xff]  ;;  %p1761_p2 = scmp.ne.s32.totalorder %s1324_s17, %s1760_s18  ;;  %p1766_p4 = scmp.lt.s32.totalorder %s1760_s18, %s1760_s18 }
  0x30   :  { %1344 = vmatprep.subr.bf16.mxu0 %v1343_v15  ;;  %1369 = vmatprep.subr.bf16.mxu1 %v1343_v15  ;;  %v1357_v38 = vpack.c.bf16 %v100_v35, %v98_v34  ;;  %v1359_v39 = vpack.c.bf16 %v105_v37, %v103_v36  ;;  %v102_v40 = vld [vmem:[#allocation6 + $0xc0] sm:$0xff]  ;;  %v104_v41 = vld [vmem:[#allocation6 + $0xd0] sm:$0xff]  ;;  %v107_v42 = vld [vmem:[#allocation6 + $0xe8] sm:$0xff] }
  0x31   :  { %v109_v43 = vld [vmem:[#allocation6 + $0xf8] sm:$0xff]  ;;  %v1361_v44 = vpack.c.bf16 %v104_v41, %v102_v40  ;;  %v106_v46 = vld [vmem:[#allocation6 + $0xe0] sm:$0xff]  ;;  %v108_v47 = vld [vmem:[#allocation6 + $0xf0] sm:$0xff]  ;;  %p1767_p5 = por %p1766_p4, %p1765_p3 }
  0x32   :  { %v1363_v45 = vpack.c.bf16 %v109_v43, %v107_v42  ;;  %v1365_v48 = vpack.c.bf16 %v108_v47, %v106_v46  ;;  %v46_v49 = vld [vmem:[#allocation3] sm:$0xff]  ;;  %v47_v51 = vld [vmem:[#allocation3 + $0x8] sm:$0xff]  ;;  %v48_v53 = vld [vmem:[#allocation3 + $0x10] sm:$0xff] }
  0x33   :  { %1346 = vmatpush1.bf16.msra.mxu0 %v1345_v20  ;;  %1377 = vmatpush1.bf16.msra.mxu1 %v1345_v20  ;;  %v62_v50 = vld [vmem:[#allocation3 + $0x80] sm:$0xff]  ;;  %v63_v52 = vld [vmem:[#allocation3 + $0x88] sm:$0xff]  ;;  %v64_v54 = vld [vmem:[#allocation3 + $0x90] sm:$0xff]  ;;  %p1768_p6 = pnand %p1767_p5, %p1761_p2 }
  0x34   :  { %1348 = vmatprep.subr.bf16.mxu0 %v1347_v21  ;;  %1370 = vmatprep.subr.bf16.mxu1 %v1347_v21  ;;  %v49_v55 = vld [vmem:[#allocation3 + $0x18] sm:$0xff]  ;;  %v50_v57 = vld [vmem:[#allocation3 + $0x20] sm:$0xff]  ;;  %v51_v59 = vld [vmem:[#allocation3 + $0x28] sm:$0xff] }
  0x35   :  { %v65_v56 = vld [vmem:[#allocation3 + $0x98] sm:$0xff]  ;;  %v66_v58 = vld [vmem:[#allocation3 + $0xa0] sm:$0xff]  ;;  %v67_v60 = vld [vmem:[#allocation3 + $0xa8] sm:$0xff] }
  0x36   :  { %v52_v61 = vld [vmem:[#allocation3 + $0x30] sm:$0xff]  ;;  %v53_v63 = vld [vmem:[#allocation3 + $0x38] sm:$0xff]  ;;  %v54_v2 = vld [vmem:[#allocation3 + $0x40] sm:$0xff] }
  0x37   :  { %1350 = vmatpush1.bf16.msra.mxu0 %v1349_v26  ;;  %1378 = vmatpush1.bf16.msra.mxu1 %v1349_v26  ;;  %v68_v62 = vld [vmem:[#allocation3 + $0xb0] sm:$0xff]  ;;  %v69_v1 = vld [vmem:[#allocation3 + $0xb8] sm:$0xff]  ;;  %v70_v3 = vld [vmem:[#allocation3 + $0xc0] sm:$0xff] }
  0x38   :  { %1352 = vmatprep.subr.bf16.mxu0 %v1351_v27  ;;  %1371 = vmatprep.subr.bf16.mxu1 %v1351_v27  ;;  %v55_v4 = vld [vmem:[#allocation3 + $0x48] sm:$0xff]  ;;  %v56_v6 = vld [vmem:[#allocation3 + $0x50] sm:$0xff]  ;;  %v57_v8 = vld [vmem:[#allocation3 + $0x58] sm:$0xff] }
  0x39   :  { %v71_v5 = vld [vmem:[#allocation3 + $0xc8] sm:$0xff]  ;;  %v72_v7 = vld [vmem:[#allocation3 + $0xd0] sm:$0xff]  ;;  %v73_v9 = vld [vmem:[#allocation3 + $0xd8] sm:$0xff] }
  0x3a   :  { %v58_v10 = vld [vmem:[#allocation3 + $0x60] sm:$0xff]  ;;  %v59_v12 = vld [vmem:[#allocation3 + $0x68] sm:$0xff]  ;;  %v60_v14 = vld [vmem:[#allocation3 + $0x70] sm:$0xff] }
  0x3b   :  { %1354 = vmatpush1.bf16.msra.mxu0 %v1353_v32  ;;  %1379 = vmatpush1.bf16.msra.mxu1 %v1353_v32  ;;  %v74_v11 = vld [vmem:[#allocation3 + $0xe0] sm:$0xff]  ;;  %v75_v13 = vld [vmem:[#allocation3 + $0xe8] sm:$0xff]  ;;  %v76_v15 = vld [vmem:[#allocation3 + $0xf0] sm:$0xff] }
  0x3c   :  { %1356 = vmatprep.subr.bf16.mxu0 %v1355_v33  ;;  %1372 = vmatprep.subr.bf16.mxu1 %v1355_v33  ;;  %v61_v16 = vld [vmem:[#allocation3 + $0x78] sm:$0xff] }
  0x3d   :  { %v77_v17 = vld [vmem:[#allocation3 + $0xf8] sm:$0xff] }
  0x3f   :  { %1358 = vmatpush1.bf16.msra.mxu0 %v1357_v38  ;;  %1380 = vmatpush1.bf16.msra.mxu1 %v1357_v38 }
  0x40   :  { %1360 = vmatprep.subr.bf16.mxu0 %v1359_v39  ;;  %1373 = vmatprep.subr.bf16.mxu1 %v1359_v39 }
  0x43   :  { %1362 = vmatpush1.bf16.msra.mxu0 %v1361_v44  ;;  %1381 = vmatpush1.bf16.msra.mxu1 %v1361_v44 }
  0x44   :  { %1364 = vmatprep.subr.bf16.mxu0 %v1363_v45  ;;  %1374 = vmatprep.subr.bf16.mxu1 %v1363_v45 }
  0x47   :  { %1366 = vmatpush1.bf16.msra.mxu0 %v1365_v48  ;;  %1382 = vmatpush1.bf16.msra.mxu1 %v1365_v48 }
  0x4a   :  { %175 = vmatmul.mubr.f32.vlgmr.msra.gmra.mrb[0].mxu0 %v46_v49  ;;  %271 = vmatmul.mubr.f32.vlgmr.msra.gmra.mrb[0].mxu1 %v62_v50 }
  0x4b   :  { %180 = vmatprep.mubr.f32.mxu0 %v1794_v0  ;;  %276 = vmatprep.mubr.f32.mxu1 %v1794_v0 }
  0x4e   :  { %181 = vmatmul.mubr.f32.gmra.mrb[2].mxu0 %v47_v51  ;;  %277 = vmatmul.mubr.f32.gmra.mrb[2].mxu1 %v63_v52 }
  0x4f   :  { %186 = vmatprep.mubr.f32.mxu0 %v1794_v0  ;;  %282 = vmatprep.mubr.f32.mxu1 %v1794_v0 }
  0x52   :  { %187 = vmatmul.mubr.f32.gmra.mrb[4].mxu0 %v48_v53  ;;  %283 = vmatmul.mubr.f32.gmra.mrb[4].mxu1 %v64_v54 }
  0x53   :  { %192 = vmatprep.mubr.f32.mxu0 %v1794_v0  ;;  %288 = vmatprep.mubr.f32.mxu1 %v1794_v0 }
  0x56   :  { %193 = vmatmul.mubr.f32.gmra.mrb[6].mxu0 %v49_v55  ;;  %289 = vmatmul.mubr.f32.gmra.mrb[6].mxu1 %v65_v56 }
  0x57   :  { %198 = vmatprep.mubr.f32.mxu0 %v1794_v0  ;;  %294 = vmatprep.mubr.f32.mxu1 %v1794_v0 }
  0x5a   :  { %199 = vmatmul.mubr.f32.gmra.mrb[8].mxu0 %v50_v57  ;;  %295 = vmatmul.mubr.f32.gmra.mrb[8].mxu1 %v66_v58 }
  0x5b   :  { %204 = vmatprep.mubr.f32.mxu0 %v1794_v0  ;;  %300 = vmatprep.mubr.f32.mxu1 %v1794_v0 }
  0x5e   :  { %205 = vmatmul.mubr.f32.gmra.mrb[10].mxu0 %v51_v59  ;;  %301 = vmatmul.mubr.f32.gmra.mrb[10].mxu1 %v67_v60 }
  0x5f   :  { %210 = vmatprep.mubr.f32.mxu0 %v1794_v0  ;;  %306 = vmatprep.mubr.f32.mxu1 %v1794_v0 }
  0x62   :  { %211 = vmatmul.mubr.f32.gmra.mrb[12].mxu0 %v52_v61  ;;  %307 = vmatmul.mubr.f32.gmra.mrb[12].mxu1 %v68_v62 }
  0x63   :  { %216 = vmatprep.mubr.f32.mxu0 %v1794_v0  ;;  %312 = vmatprep.mubr.f32.mxu1 %v1794_v0 }
  0x66   :  { %217 = vmatmul.mubr.f32.gmra.mrb[14].mxu0 %v53_v63  ;;  %313 = vmatmul.mubr.f32.gmra.mrb[14].mxu1 %v69_v1 }
  0x67   :  { %222 = vmatprep.mubr.f32.mxu0 %v1794_v0  ;;  %318 = vmatprep.mubr.f32.mxu1 %v1794_v0 }
  0x6a   :  { %223 = vmatmul.mubr.f32.gmra.mrb[16].mxu0 %v54_v2  ;;  %319 = vmatmul.mubr.f32.gmra.mrb[16].mxu1 %v70_v3 }
  0x6b   :  { %228 = vmatprep.mubr.f32.mxu0 %v1794_v0  ;;  %324 = vmatprep.mubr.f32.mxu1 %v1794_v0 }
  0x6e   :  { %229 = vmatmul.mubr.f32.gmra.mrb[18].mxu0 %v55_v4  ;;  %325 = vmatmul.mubr.f32.gmra.mrb[18].mxu1 %v71_v5 }
  0x6f   :  { %234 = vmatprep.mubr.f32.mxu0 %v1794_v0  ;;  %330 = vmatprep.mubr.f32.mxu1 %v1794_v0 }
  0x72   :  { %235 = vmatmul.mubr.f32.gmra.mrb[20].mxu0 %v56_v6  ;;  %331 = vmatmul.mubr.f32.gmra.mrb[20].mxu1 %v72_v7 }
  0x73   :  { %240 = vmatprep.mubr.f32.mxu0 %v1794_v0  ;;  %336 = vmatprep.mubr.f32.mxu1 %v1794_v0 }
  0x76   :  { %241 = vmatmul.mubr.f32.gmra.mrb[22].mxu0 %v57_v8  ;;  %337 = vmatmul.mubr.f32.gmra.mrb[22].mxu1 %v73_v9 }
  0x77   :  { %246 = vmatprep.mubr.f32.mxu0 %v1794_v0  ;;  %342 = vmatprep.mubr.f32.mxu1 %v1794_v0 }
  0x7a   :  { %247 = vmatmul.mubr.f32.gmra.mrb[24].mxu0 %v58_v10  ;;  %343 = vmatmul.mubr.f32.gmra.mrb[24].mxu1 %v74_v11 }
  0x7b   :  { %252 = vmatprep.mubr.f32.mxu0 %v1794_v0  ;;  %348 = vmatprep.mubr.f32.mxu1 %v1794_v0 }
  0x7e   :  { %253 = vmatmul.mubr.f32.gmra.mrb[26].mxu0 %v59_v12  ;;  %349 = vmatmul.mubr.f32.gmra.mrb[26].mxu1 %v75_v13 }
  0x7f   :  { %258 = vmatprep.mubr.f32.mxu0 %v1794_v0  ;;  %354 = vmatprep.mubr.f32.mxu1 %v1794_v0 }
  0x82   :  { %259 = vmatmul.mubr.f32.gmra.mrb[28].mxu0 %v60_v14  ;;  %355 = vmatmul.mubr.f32.gmra.mrb[28].mxu1 %v76_v15 }
  0x83   :  { %264 = vmatprep.mubr.f32.mxu0 %v1794_v0  ;;  %360 = vmatprep.mubr.f32.mxu1 %v1794_v0 }
  0x86   :  { %265 = vmatmul.mubr.f32.gmra.mrb[30].mxu0 %v61_v16  ;;  %361 = vmatmul.mubr.f32.gmra.mrb[30].mxu1 %v77_v17 }
 0x11d   :  { %v176_v19 = vpop.f32.mrb[0].mxu0  ;;  %v272_v20 = vpop.f32.mrb[0].mxu1 }
 0x11e   :  { %v1884_v21 = vmul.f32 %v1881_v18, %v176_v19  ;;  %v178_v22 = vpop.f32.mrb[1].mxu0  ;;  %v274_v23 = vpop.f32.mrb[1].mxu1  ;;  %v1890_v0 = vmul.f32 %v1881_v18, %v272_v20 }
 0x11f   :  { %v1887_v24 = vmul.f32 %v1881_v18, %v178_v22  ;;  %v1893_v25 = vmul.f32 %v1881_v18, %v274_v23 }
 0x121   :  { %2897 = vst [vmem:[#allocation12_spill] sm:$0xff] %v1887_v24  ;;  %2898 = vst [vmem:[#allocation13_spill] sm:$0xff] %v1893_v25  ;;  %v278_v26 = vpop.f32.mrb[2].mxu1  ;;  %v433_v27 = vmax.f32 %v1884_v21, %v1887_v24  ;;  %v182_v28 = vpop.f32.mrb[2].mxu0  ;;  %v481_v35 = vmax.f32 %v1890_v0, %v1893_v25 }
 0x122   :  { %v1898_v29 = vmul.f32 %v1881_v18, %v278_v26  ;;  %v280_v30 = vpop.f32.mrb[3].mxu1  ;;  %v184_v31 = vpop.f32.mrb[3].mxu0  ;;  %v1904_v33 = vmul.f32 %v1881_v18, %v182_v28 }
 0x123   :  { %v1901_v32 = vmul.f32 %v1881_v18, %v280_v30  ;;  %434 = vmax.xlane.f32.xlu0 %v433_v27  ;;  %v1907_v34 = vmul.f32 %v1881_v18, %v184_v31 }
 0x125   :  { %2899 = vst [vmem:[#allocation14_spill] sm:$0xff] %v1901_v32  ;;  %v188_v36 = vpop.f32.mrb[4].mxu0  ;;  %v484_v37 = vmax.f32 %v1898_v29, %v1901_v32  ;;  %v284_v38 = vpop.f32.mrb[4].mxu1  ;;  %v436_v43 = vmax.f32 %v1904_v33, %v1907_v34 }
 0x126   :  { %v1914_v39 = vmul.f32 %v1881_v18, %v188_v36  ;;  %v190_v40 = vpop.f32.mrb[5].mxu0  ;;  %v286_v41 = vpop.f32.mrb[5].mxu1  ;;  %v1922_v45 = vmul.f32 %v1881_v18, %v284_v38 }
 0x127   :  { %v1917_v42 = vmul.f32 %v1881_v18, %v190_v40  ;;  %485 = vmax.xlane.f32.xlu1 %v484_v37  ;;  %482 = vmax.xlane.f32.xlu0 %v481_v35  ;;  %v1925_v46 = vmul.f32 %v1881_v18, %v286_v41 }
 0x129   :  { %2900 = vst [vmem:[#allocation15_spill] sm:$0xff] %v1917_v42  ;;  %v194_v44 = vpop.f32.mrb[6].mxu0  ;;  %2901 = vst [vmem:[#allocation16_spill] sm:$0xff] %v1925_v46  ;;  %v439_v47 = vmax.f32 %v1914_v39, %v1917_v42  ;;  %v290_v48 = vpop.f32.mrb[6].mxu1  ;;  %v487_v53 = vmax.f32 %v1922_v45, %v1925_v46 }
 0x12a   :  { %v1930_v49 = vmul.f32 %v1881_v18, %v194_v44  ;;  %v196_v50 = vpop.f32.mrb[7].mxu0  ;;  %v292_v51 = vpop.f32.mrb[7].mxu1  ;;  %v1938_v55 = vmul.f32 %v1881_v18, %v290_v48 }
 0x12b   :  { %v1933_v52 = vmul.f32 %v1881_v18, %v196_v50  ;;  %437 = vmax.xlane.f32.xlu0 %v436_v43  ;;  %440 = vmax.xlane.f32.xlu1 %v439_v47  ;;  %v1941_v56 = vmul.f32 %v1881_v18, %v292_v51 }
 0x12d   :  { %v200_v54 = vpop.f32.mrb[8].mxu0  ;;  %2902 = vst [vmem:[#allocation17_spill] sm:$0xff] %v1941_v56  ;;  %v442_v57 = vmax.f32 %v1930_v49, %v1933_v52  ;;  %v296_v58 = vpop.f32.mrb[8].mxu1  ;;  %v490_v63 = vmax.f32 %v1938_v55, %v1941_v56 }
 0x12e   :  { %v1946_v59 = vmul.f32 %v1881_v18, %v200_v54  ;;  %v202_v60 = vpop.f32.mrb[9].mxu0  ;;  %v298_v61 = vpop.f32.mrb[9].mxu1  ;;  %v1954_v2 = vmul.f32 %v1881_v18, %v296_v58 }
 0x12f   :  { %v1949_v62 = vmul.f32 %v1881_v18, %v202_v60  ;;  %488 = vmax.xlane.f32.xlu0 %v487_v53  ;;  %443 = vmax.xlane.f32.xlu1 %v442_v57  ;;  %v1957_v3 = vmul.f32 %v1881_v18, %v298_v61 }
 0x130   :  { %2904 = vst [vmem:[#allocation19_spill] sm:$0xff] %v1954_v2 }
 0x131   :  { %2903 = vst [vmem:[#allocation18_spill] sm:$0xff] %v1949_v62  ;;  %v206_v1 = vpop.f32.mrb[10].mxu0  ;;  %2905 = vst [vmem:[#allocation20_spill] sm:$0xff] %v1957_v3  ;;  %v445_v4 = vmax.f32 %v1946_v59, %v1949_v62  ;;  %v302_v5 = vpop.f32.mrb[10].mxu1  ;;  %v493_v10 = vmax.f32 %v1954_v2, %v1957_v3 }
 0x132   :  { %v1962_v6 = vmul.f32 %v1881_v18, %v206_v1  ;;  %v208_v7 = vpop.f32.mrb[11].mxu0  ;;  %v304_v8 = vpop.f32.mrb[11].mxu1  ;;  %v1970_v12 = vmul.f32 %v1881_v18, %v302_v5  ;;  %v960_v1 = vmax.f32 %v1898_v29, %v1890_v0 }
 0x133   :  { %v1965_v9 = vmul.f32 %v1881_v18, %v208_v7  ;;  %491 = vmax.xlane.f32.xlu1 %v490_v63  ;;  %446 = vmax.xlane.f32.xlu0 %v445_v4  ;;  %v1973_v13 = vmul.f32 %v1881_v18, %v304_v8 }
 0x134   :  { %2906 = vst [vmem:[#allocation21_spill] sm:$0xff] %v1962_v6  ;;  %2908 = vst [vmem:[#allocation23_spill] sm:$0xff] %v1970_v12 }
 0x135   :  { %2907 = vst [vmem:[#allocation22_spill] sm:$0xff] %v1965_v9  ;;  %v212_v11 = vpop.f32.mrb[12].mxu0  ;;  %2909 = vst [vmem:[#allocation24_spill] sm:$0xff] %v1973_v13  ;;  %v448_v14 = vmax.f32 %v1962_v6, %v1965_v9  ;;  %v308_v15 = vpop.f32.mrb[12].mxu1  ;;  %v496_v22 = vmax.f32 %v1970_v12, %v1973_v13 }
 0x136   :  { %v1978_v16 = vmul.f32 %v1881_v18, %v212_v11  ;;  %v214_v17 = vpop.f32.mrb[13].mxu0  ;;  %v310_v19 = vpop.f32.mrb[13].mxu1  ;;  %v1986_v26 = vmul.f32 %v1881_v18, %v308_v15  ;;  %v962_v11 = vmax.f32 %v960_v1, %v1922_v45 }
 0x137   :  { %v1981_v20 = vmul.f32 %v1881_v18, %v214_v17  ;;  %494 = vmax.xlane.f32.xlu0 %v493_v10  ;;  %449 = vmax.xlane.f32.xlu1 %v448_v14  ;;  %v1989_v27 = vmul.f32 %v1881_v18, %v310_v19 }
 0x138   :  { %2910 = vst [vmem:[#allocation25_spill] sm:$0xff] %v1978_v16  ;;  %2912 = vst [vmem:[#allocation27_spill] sm:$0xff] %v1986_v26 }
 0x139   :  { %2911 = vst [vmem:[#allocation26_spill] sm:$0xff] %v1981_v20  ;;  %v218_v23 = vpop.f32.mrb[14].mxu0  ;;  %2913 = vst [vmem:[#allocation28_spill] sm:$0xff] %v1989_v27  ;;  %v451_v28 = vmax.f32 %v1978_v16, %v1981_v20  ;;  %v314_v30 = vpop.f32.mrb[14].mxu1  ;;  %v499_v38 = vmax.f32 %v1986_v26, %v1989_v27 }
 0x13a   :  { %v1994_v31 = vmul.f32 %v1881_v18, %v218_v23  ;;  %v220_v35 = vpop.f32.mrb[15].mxu0  ;;  %v316_v36 = vpop.f32.mrb[15].mxu1  ;;  %v2002_v41 = vmul.f32 %v1881_v18, %v314_v30  ;;  %v997_v23 = vmax.f32 %v1901_v32, %v1893_v25 }
 0x13b   :  { %v1997_v37 = vmul.f32 %v1881_v18, %v220_v35  ;;  %497 = vmax.xlane.f32.xlu1 %v496_v22  ;;  %452 = vmax.xlane.f32.xlu0 %v451_v28  ;;  %v2005_v43 = vmul.f32 %v1881_v18, %v316_v36  ;;  %v964_v28 = vmax.f32 %v962_v11, %v1938_v55 }
 0x13c   :  { %2914 = vst [vmem:[#allocation29_spill] sm:$0xff] %v1994_v31  ;;  %2916 = vst [vmem:[#allocation31_spill] sm:$0xff] %v2002_v41 }
 0x13d   :  { %2915 = vst [vmem:[#allocation30_spill] sm:$0xff] %v1997_v37  ;;  %v224_v40 = vpop.f32.mrb[16].mxu0  ;;  %2917 = vst [vmem:[#allocation32_spill] sm:$0xff] %v2005_v43  ;;  %v454_v44 = vmax.f32 %v1994_v31, %v1997_v37  ;;  %v320_v47 = vpop.f32.mrb[16].mxu1  ;;  %v502_v54 = vmax.f32 %v2002_v41, %v2005_v43 }
 0x13e   :  { %v2010_v48 = vmul.f32 %v1881_v18, %v224_v40  ;;  %v226_v50 = vpop.f32.mrb[17].mxu0  ;;  %v322_v51 = vpop.f32.mrb[17].mxu1  ;;  %v2018_v58 = vmul.f32 %v1881_v18, %v320_v47  ;;  %v961_v47 = vmax.f32 %v1954_v2, %v964_v28 }
 0x13f   :  { %v2013_v53 = vmul.f32 %v1881_v18, %v226_v50  ;;  %500 = vmax.xlane.f32.xlu0 %v499_v38  ;;  %455 = vmax.xlane.f32.xlu1 %v454_v44  ;;  %v2021_v60 = vmul.f32 %v1881_v18, %v322_v51  ;;  %v999_v44 = vmax.f32 %v997_v23, %v1925_v46 }
 0x140   :  { %2918 = vst [vmem:[#allocation33_spill] sm:$0xff] %v2010_v48  ;;  %2920 = vst [vmem:[#allocation35_spill] sm:$0xff] %v2018_v58  ;;  %v963_v1 = vmax.f32 %v961_v47, %v1970_v12 }
 0x141   :  { %2919 = vst [vmem:[#allocation34_spill] sm:$0xff] %v2013_v53  ;;  %v230_v57 = vpop.f32.mrb[18].mxu0  ;;  %2921 = vst [vmem:[#allocation36_spill] sm:$0xff] %v2021_v60  ;;  %v457_v61 = vmax.f32 %v2010_v48, %v2013_v53  ;;  %v326_v63 = vpop.f32.mrb[18].mxu1  ;;  %v505_v10 = vmax.f32 %v2018_v58, %v2021_v60 }
 0x142   :  { %v2028_v4 = vmul.f32 %v1881_v18, %v230_v57  ;;  %v232_v5 = vpop.f32.mrb[19].mxu0  ;;  %v328_v7 = vpop.f32.mrb[19].mxu1  ;;  %v2037_v15 = vmul.f32 %v1881_v18, %v326_v63  ;;  %v1001_v63 = vmax.f32 %v999_v44, %v1941_v56  ;;  %v965_v28 = vmax.f32 %v963_v1, %v1986_v26 }
 0x143   :  { %v2031_v8 = vmul.f32 %v1881_v18, %v232_v5  ;;  %503 = vmax.xlane.f32.xlu1 %v502_v54  ;;  %458 = vmax.xlane.f32.xlu0 %v457_v61  ;;  %v2040_v17 = vmul.f32 %v1881_v18, %v328_v7 }
 0x144   :  { %2922 = vst [vmem:[#allocation37_spill] sm:$0xff] %v2028_v4  ;;  %2924 = vst [vmem:[#allocation39_spill] sm:$0xff] %v2037_v15  ;;  %v998_v23 = vmax.f32 %v1957_v3, %v1001_v63  ;;  %v966_v1 = vmax.f32 %v2002_v41, %v965_v28 }
 0x145   :  { %2923 = vst [vmem:[#allocation38_spill] sm:$0xff] %v2031_v8  ;;  %v236_v14 = vpop.f32.mrb[20].mxu0  ;;  %2925 = vst [vmem:[#allocation40_spill] sm:$0xff] %v2040_v17  ;;  %v460_v19 = vmax.f32 %v2028_v4, %v2031_v8  ;;  %v332_v22 = vpop.f32.mrb[20].mxu1  ;;  %v508_v40 = vmax.f32 %v2037_v15, %v2040_v17 }
 0x146   :  { %v2048_v30 = vmul.f32 %v1881_v18, %v236_v14  ;;  %v238_v35 = vpop.f32.mrb[21].mxu0  ;;  %v334_v36 = vpop.f32.mrb[21].mxu1  ;;  %v2058_v51 = vmul.f32 %v1881_v18, %v332_v22  ;;  %v983_v22 = vmax.f32 %v1887_v24, %v1917_v42  ;;  %v1000_v63 = vmax.f32 %v998_v23, %v1973_v13 }
 0x147   :  { %v2051_v38 = vmul.f32 %v1881_v18, %v238_v35  ;;  %506 = vmax.xlane.f32.xlu0 %v505_v10  ;;  %461 = vmax.xlane.f32.xlu1 %v460_v19  ;;  %v2061_v54 = vmul.f32 %v1881_v18, %v334_v36  ;;  %v946_v19 = vmax.f32 %v1884_v21, %v1914_v39 }
 0x148   :  { %2926 = vst [vmem:[#allocation41_spill] sm:$0xff] %v2048_v30  ;;  %2928 = vst [vmem:[#allocation43_spill] sm:$0xff] %v2058_v51  ;;  %v947_v35 = vmax.f32 %v1904_v33, %v1930_v49  ;;  %v1002_v28 = vmax.f32 %v1000_v63, %v1989_v27 }
 0x149   :  { %2927 = vst [vmem:[#allocation42_spill] sm:$0xff] %v2051_v38  ;;  %v242_v50 = vpop.f32.mrb[22].mxu0  ;;  %2929 = vst [vmem:[#allocation44_spill] sm:$0xff] %v2061_v54  ;;  %v463_v57 = vmax.f32 %v2048_v30, %v2051_v38  ;;  %v338_v61 = vpop.f32.mrb[22].mxu1  ;;  %v511_v14 = vmax.f32 %v2058_v51, %v2061_v54 }
 0x14a   :  { %v2068_v5 = vmul.f32 %v1881_v18, %v242_v50  ;;  %v244_v7 = vpop.f32.mrb[23].mxu0  ;;  %v340_v10 = vpop.f32.mrb[23].mxu1 }
 0x14b   :  { %v2071_v11 = vmul.f32 %v1881_v18, %v244_v7  ;;  %509 = vmax.xlane.f32.xlu1 %v508_v40  ;;  %464 = vmax.xlane.f32.xlu0 %v463_v57  ;;  %v2084_v40 = vmul.f32 %v1881_v18, %v338_v61  ;;  %v2087_v44 = vmul.f32 %v1881_v18, %v340_v10 }
 0x14c   :  { %2930 = vst [vmem:[#allocation45_spill] sm:$0xff] %v2068_v5  ;;  %v948_v57 = vmax.f32 %v946_v19, %v1946_v59  ;;  %v949_v61 = vmax.f32 %v947_v35, %v1962_v6  ;;  %v985_v19 = vmax.f32 %v983_v22, %v1949_v62 }
 0x14d   :  { %2931 = vst [vmem:[#allocation46_spill] sm:$0xff] %v2071_v11  ;;  %v248_v36 = vpop.f32.mrb[24].mxu0  ;;  %2932 = vst [vmem:[#allocation47_spill] sm:$0xff] %v2084_v40  ;;  %v466_v47 = vmax.f32 %v2068_v5, %v2071_v11  ;;  %v344_v50 = vpop.f32.mrb[24].mxu1  ;;  %v514_v46 = vmax.f32 %v2084_v40, %v2087_v44 }
 0x14e   :  { %2933 = vst [vmem:[#allocation48_spill] sm:$0xff] %v2087_v44  ;;  %v2095_v7 = vmul.f32 %v1881_v18, %v248_v36  ;;  %v250_v3 = vpop.f32.mrb[25].mxu0  ;;  %v346_v56 = vpop.f32.mrb[25].mxu1  ;;  %v950_v23 = vmax.f32 %v948_v57, %v1978_v16  ;;  %v968_v36 = vmax.f32 %v966_v1, %v2018_v58  ;;  %v951_v13 = vmax.f32 %v949_v61, %v1994_v31 }
 0x14f   :  { %v2099_v10 = vmul.f32 %v1881_v18, %v250_v3  ;;  %512 = vmax.xlane.f32.xlu0 %v511_v14  ;;  %467 = vmax.xlane.f32.xlu1 %v466_v47  ;;  %v2109_v35 = vmul.f32 %v1881_v18, %v344_v50  ;;  %v2112_v3 = vmul.f32 %v1881_v18, %v346_v56 }
 0x150   :  { %2934 = vst [vmem:[#allocation49_spill] sm:$0xff] %v2095_v7  ;;  %v952_v22 = vmax.f32 %v950_v23, %v2010_v48  ;;  %v970_v57 = vmax.f32 %v968_v36, %v2037_v15  ;;  %v987_v25 = vmax.f32 %v985_v19, %v1981_v20  ;;  %v953_v62 = vmax.f32 %v951_v13, %v2028_v4 }
 0x151   :  { %2935 = vst [vmem:[#allocation50_spill] sm:$0xff] %v2099_v10  ;;  %v254_v32 = vpop.f32.mrb[26].mxu0  ;;  %2936 = vst [vmem:[#allocation51_spill] sm:$0xff] %v2109_v35  ;;  %v469_v14 = vmax.f32 %v2095_v7, %v2099_v10  ;;  %v350_v47 = vpop.f32.mrb[26].mxu1  ;;  %v517_v23 = vmax.f32 %v2109_v35, %v2112_v3 }
 0x152   :  { %v2119_v63 = vmul.f32 %v1881_v18, %v254_v32  ;;  %v256_v1 = vpop.f32.mrb[27].mxu0  ;;  %v2122_v61 = vmul.f32 %v1881_v18, %v350_v47  ;;  %v352_v50 = vpop.f32.mrb[27].mxu1  ;;  %v954_v36 = vmax.f32 %v952_v22, %v2048_v30  ;;  %v972_v32 = vmax.f32 %v970_v57, %v2058_v51 }
 0x153   :  { %v2125_v27 = vmul.f32 %v1881_v18, %v256_v1  ;;  %515 = vmax.xlane.f32.xlu1 %v514_v46  ;;  %470 = vmax.xlane.f32.xlu0 %v469_v14  ;;  %v2128_v56 = vmul.f32 %v1881_v18, %v352_v50  ;;  %v1003_v47 = vmax.f32 %v2005_v43, %v1002_v28 }
 0x154   :  { %2937 = vst [vmem:[#allocation52_spill] sm:$0xff] %v2119_v63  ;;  %2938 = vst [vmem:[#allocation53_spill] sm:$0xff] %v2122_v61  ;;  %v956_v50 = vmax.f32 %v954_v36, %v2095_v7  ;;  %v974_v42 = vmax.f32 %v972_v32, %v2084_v40  ;;  %v955_v32 = vmax.f32 %v953_v62, %v2068_v5 }
 0x155   :  { %2939 = vst [vmem:[#allocation54_spill] sm:$0xff] %v2125_v27  ;;  %v260_v1 = vpop.f32.mrb[28].mxu0  ;;  %v472_v46 = vmax.f32 %v2119_v63, %v2125_v27  ;;  %v356_v14 = vpop.f32.mrb[28].mxu1  ;;  %v520_v19 = vmax.f32 %v2122_v61, %v2128_v56  ;;  %v989_v20 = vmax.f32 %v987_v25, %v2013_v53  ;;  %v1005_v40 = vmax.f32 %v1003_v47, %v2021_v60 }
 0x156   :  { %v2142_v24 = vmul.f32 %v1881_v18, %v260_v1  ;;  %v262_v22 = vpop.f32.mrb[29].mxu0  ;;  %v358_v57 = vpop.f32.mrb[29].mxu1  ;;  %v2150_v13 = vmul.f32 %v1881_v18, %v356_v14  ;;  %v967_v1 = vmax.f32 %v2109_v35, %v974_v42  ;;  %v957_v14 = vmax.f32 %v955_v32, %v2119_v63 }
 0x157   :  { %v2147_v28 = vmul.f32 %v1881_v18, %v262_v22  ;;  %518 = vmax.xlane.f32.xlu0 %v517_v23  ;;  %473 = vmax.xlane.f32.xlu1 %v472_v46  ;;  %v2153_v36 = vmul.f32 %v1881_v18, %v358_v57 }
 0x158   :  { %2940 = vst [vmem:[#allocation55_spill] sm:$0xff] %v2142_v24  ;;  %2942 = vst [vmem:[#allocation57_spill] sm:$0xff] %v2150_v13  ;;  %v958_v43 = vmax.f32 %v956_v50, %v2142_v24 }
 0x159   :  { %2941 = vst [vmem:[#allocation56_spill] sm:$0xff] %v2147_v28  ;;  %v266_v22 = vpop.f32.mrb[30].mxu0  ;;  %v475_v23 = vmax.f32 %v2142_v24, %v2147_v28  ;;  %v362_v46 = vpop.f32.mrb[30].mxu1  ;;  %v523_v32 = vmax.f32 %v2150_v13, %v2153_v36 }
 0x15a   :  { %v969_v51 = vmax.f32 %v967_v1, %v958_v43  ;;  %v2164_v57 = vmul.f32 %v1881_v18, %v266_v22  ;;  %v268_v62 = vpop.f32.mrb[31].mxu0  ;;  %v2167_v42 = vmul.f32 %v1881_v18, %v362_v46  ;;  %v364_v50 = vpop.f32.mrb[31].mxu1  ;;  %v984_v43 = vmax.f32 %v1907_v34, %v1933_v52 }
 0x15b   :  { %v2170_v25 = vmul.f32 %v1881_v18, %v268_v62  ;;  %521 = vmax.xlane.f32.xlu1 %v520_v19  ;;  %476 = vmax.xlane.f32.xlu0 %v475_v23  ;;  %v2173_v47 = vmul.f32 %v1881_v18, %v364_v50  ;;  %v991_v46 = vmax.f32 %v989_v20, %v2051_v38 }
 0x15c   :  { %2943 = vst [vmem:[#allocation58_spill] sm:$0xff] %v2164_v57  ;;  %2944 = vst [vmem:[#allocation59_spill] sm:$0xff] %v2167_v42  ;;  %v971_v1 = vmax.f32 %v969_v51, %v2122_v61  ;;  %v959_v22 = vmax.f32 %v957_v14, %v2164_v57  ;;  %v1007_v62 = vmax.f32 %v1005_v40, %v2040_v17 }
 0x15d   :  { %2945 = vst [vmem:[#allocation60_spill] sm:$0xff] %v2170_v25  ;;  %v478_v19 = vmax.f32 %v2164_v57, %v2170_v25  ;;  %v986_v18 = vmax.f32 %v984_v43, %v1965_v9  ;;  %v993_v60 = vmax.f32 %v991_v46, %v2099_v10  ;;  %v526_v51 = vmax.f32 %v2167_v42, %v2173_v47 }
 0x15e   :  { %v973_v23 = vmax.f32 %v971_v1, %v959_v22  ;;  %v1009_v50 = vmax.f32 %v1007_v62, %v2061_v54 }
 0x15f   :  { %524 = vmax.xlane.f32.xlu0 %v523_v32  ;;  %479 = vmax.xlane.f32.xlu1 %v478_v19  ;;  %v988_v20 = vmax.f32 %v986_v18, %v1997_v37  ;;  %v995_v17 = vmax.f32 %v993_v60, %v2147_v28 }
 0x160   :  { %v975_v14 = vmax.f32 %v973_v23, %v2150_v13  ;;  %v1011_v40 = vmax.f32 %v1009_v50, %v2087_v44 }
 0x161   :  { %v990_v1 = vmax.f32 %v988_v20, %v2031_v8 }
 0x162   :  { %v976_v43 = vmax.f32 %v2167_v42, %v975_v14  ;;  %v1004_v22 = vmax.f32 %v2112_v3, %v1011_v40 }
 0x163   :  { %527 = vmax.xlane.f32.xlu1 %v526_v51  ;;  %v992_v46 = vmax.f32 %v990_v1, %v2071_v11 }
 0x164   :  { %v977_v32 = vrot.slane %v976_v43, 4  ;;  %v1006_v62 = vmax.f32 %v1004_v22, %v995_v17 }
 0x165   :  { %v994_v23 = vmax.f32 %v992_v46, %v2125_v27 }
 0x166   :  { %v978_v19 = vmax.f32 %v976_v43, %v977_v32  ;;  %v1008_v18 = vmax.f32 %v1006_v62, %v2128_v56 }
 0x167   :  { %v996_v50 = vmax.f32 %v994_v23, %v2170_v25 }
 0x168   :  { %v979_v54 = vrot.slane %v978_v19, 2 }
 0x169   :  { %v1010_v14 = vmax.f32 %v1008_v18, %v996_v50 }
 0x16a   :  { %v980_v60 = vmax.f32 %v978_v19, %v979_v54 }
 0x16b   :  { %v1012_v20 = vmax.f32 %v1010_v14, %v2153_v36 }
 0x16c   :  { %v981_v44 = vrot.slane %v980_v60, 1 }
 0x16d   :  { %v1013_v54 = vmax.f32 %v2173_v47, %v1012_v20 }
 0x16e   :  { %v2201_v28 = vmax.f32 %v980_v60, %v981_v44 }
 0x16f   :  { %v1014_v18 = vrot.slane %v1013_v54, 4 }
 0x170   :  { %2946 = vst [vmem:[#allocation61_spill] sm:$0xff] %v2201_v28  ;;  %v1020_v51 = vsub.f32 %v1884_v21, %v2201_v28  ;;  %v1022_v17 = vsub.f32 %v1904_v33, %v2201_v28  ;;  %v1024_v40 = vsub.f32 %v1914_v39, %v2201_v28  ;;  %v1026_v43 = vsub.f32 %v1930_v49, %v2201_v28 }
 0x171   :  { %v1028_v44 = vsub.f32 %v1946_v59, %v2201_v28  ;;  %v1030_v1 = vsub.f32 %v1962_v6, %v2201_v28  ;;  %v1032_v22 = vsub.f32 %v1978_v16, %v2201_v28  ;;  %v1034_v19 = vsub.f32 %v1994_v31, %v2201_v28 }
 0x172   :  { %v1084_v32 = vmul.f32 1.442695, %v1020_v51  ;;  %v1088_v46 = vmul.f32 1.442695, %v1022_v17  ;;  %v1092_v62 = vmul.f32 1.442695, %v1024_v40  ;;  %v1036_v50 = vsub.f32 %v2010_v48, %v2201_v28 }
 0x173   :  { %v1096_v23 = vmul.f32 1.442695, %v1026_v43  ;;  %v1100_v60 = vmul.f32 1.442695, %v1028_v44  ;;  %v1038_v14 = vsub.f32 %v2028_v4, %v2201_v28  ;;  %v1104_v20 = vmul.f32 1.442695, %v1030_v1 }
 0x174   :  { %1392 = vpow2.f32 %v1084_v32  ;;  %v1040_v51 = vsub.f32 %v2048_v30, %v2201_v28  ;;  %v1108_v17 = vmul.f32 1.442695, %v1032_v22  ;;  %v1042_v40 = vsub.f32 %v2068_v5, %v2201_v28 }
 0x175   :  { %1394 = vpow2.f32 %v1088_v46  ;;  %v1112_v43 = vmul.f32 1.442695, %v1034_v19  ;;  %v1015_v31 = vmax.f32 %v1013_v54, %v1014_v18  ;;  %v1044_v32 = vsub.f32 %v2095_v7, %v2201_v28 }
 0x176   :  { %1396 = vpow2.f32 %v1092_v62  ;;  %v1116_v44 = vmul.f32 1.442695, %v1036_v50  ;;  %v1046_v46 = vsub.f32 %v2119_v63, %v2201_v28  ;;  %v1120_v1 = vmul.f32 1.442695, %v1038_v14 }
 0x177   :  { %1398 = vpow2.f32 %v1096_v23  ;;  %v1048_v62 = vsub.f32 %v2142_v24, %v2201_v28  ;;  %v1124_v22 = vmul.f32 1.442695, %v1040_v51  ;;  %v1050_v23 = vsub.f32 %v2164_v57, %v2201_v28 }
 0x178   :  { %1400 = vpow2.f32 %v1100_v60  ;;  %v1128_v54 = vmul.f32 1.442695, %v1042_v40  ;;  %v1016_v19 = vrot.slane %v1015_v31, 2  ;;  %v1052_v18 = vsub.f32 %v1890_v0, %v2201_v28 }
 0x179   :  { %1402 = vpow2.f32 %v1104_v20  ;;  %v1132_v50 = vmul.f32 1.442695, %v1044_v32  ;;  %v1054_v60 = vsub.f32 %v1898_v29, %v2201_v28  ;;  %v1136_v14 = vmul.f32 1.442695, %v1046_v46 }
 0x17a   :  { %1404 = vpow2.f32 %v1108_v17  ;;  %v1056_v51 = vsub.f32 %v1922_v45, %v2201_v28  ;;  %v1140_v17 = vmul.f32 1.442695, %v1048_v62  ;;  %v1058_v40 = vsub.f32 %v1938_v55, %v2201_v28 }
 0x17b   :  { %1406 = vpow2.f32 %v1112_v43  ;;  %v1144_v43 = vmul.f32 1.442695, %v1050_v23  ;;  %v1017_v24 = vmax.f32 %v1015_v31, %v1016_v19  ;;  %v1060_v32 = vsub.f32 %v1954_v2, %v2201_v28 }
 0x17c   :  { %1408 = vpow2.f32 %v1116_v44  ;;  %v1062_v7 = vsub.f32 %v1970_v12, %v2201_v28  ;;  %v1152_v62 = vmul.f32 1.442695, %v1054_v60  ;;  %v1064_v5 = vsub.f32 %v1986_v26, %v2201_v28 }
 0x17d   :  { %1410 = vpow2.f32 %v1120_v1  ;;  %v1148_v1 = vmul.f32 1.442695, %v1052_v18  ;;  %v1156_v23 = vmul.f32 1.442695, %v1056_v51  ;;  %v1066_v19 = vsub.f32 %v2002_v41, %v2201_v28  ;;  %v2948_v41 = vld [vmem:[#allocation47_spill] sm:$0xff] }
 0x17e   :  { %v1393_v20 = vpop.eup %1392  ;;  %1412 = vpow2.f32 %v1124_v22  ;;  %v1160_v18 = vmul.f32 1.442695, %v1058_v40  ;;  %v1164_v60 = vmul.f32 1.442695, %v1060_v32  ;;  %v1168_v51 = vmul.f32 1.442695, %v1062_v7 }
 0x17f   :  { %v1395_v57 = vpop.eup %1394  ;;  %1414 = vpow2.f32 %v1128_v54  ;;  %v1172_v40 = vmul.f32 1.442695, %v1064_v5  ;;  %v1176_v32 = vmul.f32 1.442695, %v1066_v19  ;;  %v1078_v5 = vsub.f32 %v2122_v61, %v2201_v28 }
 0x180   :  { %v1397_v44 = vpop.eup %1396  ;;  %1416 = vpow2.f32 %v1132_v50  ;;  %v1212_v46 = vadd.f32 %v1395_v57, %v1393_v20  ;;  %v1018_v57 = vrot.slane %v1017_v24, 1  ;;  %v1068_v20 = vsub.f32 %v2018_v58, %v2201_v28 }
 0x181   :  { %v1399_v63 = vpop.eup %1398  ;;  %1418 = vpow2.f32 %v1136_v14  ;;  %v1074_v58 = vsub.f32 %v2948_v41, %v2201_v28 }
 0x182   :  { %v1401_v22 = vpop.eup %1400  ;;  %1420 = vpow2.f32 %v1140_v17  ;;  %v1213_v31 = vadd.f32 %v1397_v44, %v1212_v46  ;;  %v1070_v17 = vsub.f32 %v2037_v15, %v2201_v28  ;;  %v2947_v46 = vld [vmem:[#allocation43_spill] sm:$0xff]  ;;  %v1180_v7 = vmul.f32 1.442695, %v1068_v20 }
 0x183   :  { %v1403_v54 = vpop.eup %1402  ;;  %1422 = vpow2.f32 %v1144_v43  ;;  %v1072_v4 = vsub.f32 %v2947_v46, %v2201_v28  ;;  %v1192_v20 = vmul.f32 1.442695, %v1074_v58 }
 0x184   :  { %v1405_v50 = vpop.eup %1404  ;;  %1424 = vpow2.f32 %v1148_v1  ;;  %v1214_v14 = vadd.f32 %v1399_v63, %v1213_v31  ;;  %v2261_v63 = vmax.f32 %v1017_v24, %v1018_v57 }
 0x185   :  { %v1407_v30 = vpop.eup %1406  ;;  %1426 = vpow2.f32 %v1152_v62  ;;  %v1076_v62 = vsub.f32 %v2109_v35, %v2201_v28  ;;  %v1188_v24 = vmul.f32 1.442695, %v1072_v4 }
 0x186   :  { %v1409_v44 = vpop.eup %1408  ;;  %1428 = vpow2.f32 %v1156_v23  ;;  %v1215_v43 = vadd.f32 %v1401_v22, %v1214_v14  ;;  %v1184_v22 = vmul.f32 1.442695, %v1070_v17  ;;  %v1082_v14 = vsub.f32 %v2167_v42, %v2201_v28  ;;  %v2949_v17 = vld [vmem:[#allocation12_spill] sm:$0xff] }
 0x187   :  { %v1411_v48 = vpop.eup %1410  ;;  %1430 = vpow2.f32 %v1160_v18  ;;  %v1080_v18 = vsub.f32 %v2150_v13, %v2201_v28  ;;  %v1023_v4 = vsub.f32 %v1907_v34, %v2261_v63  ;;  %v2951_v28 = vld [vmem:[#allocation18_spill] sm:$0xff] }
 0x188   :  { %v1413_v1 = vpop.eup %1412  ;;  %1432 = vpow2.f32 %v1164_v60  ;;  %v1216_v31 = vadd.f32 %v1403_v54, %v1215_v43  ;;  %v1196_v60 = vmul.f32 1.442695, %v1076_v62  ;;  %v1029_v42 = vsub.f32 %v2951_v28, %v2261_v63  ;;  %v2952_v13 = vld [vmem:[#allocation26_spill] sm:$0xff] }
 0x189   :  { %v1415_v15 = vpop.eup %1414  ;;  %1434 = vpow2.f32 %v1168_v51  ;;  %v1021_v51 = vsub.f32 %v2949_v17, %v2261_v63  ;;  %v1033_v35 = vsub.f32 %v2952_v13, %v2261_v63  ;;  %v2960_v13 = vld [vmem:[#allocation24_spill] sm:$0xff] }
 0x18a   :  { %v1417_v23 = vpop.eup %1416  ;;  %1436 = vpow2.f32 %v1172_v40  ;;  %v1217_v19 = vadd.f32 %v1405_v50, %v1216_v31  ;;  %v1200_v40 = vmul.f32 1.442695, %v1078_v5  ;;  %v2950_v31 = vld [vmem:[#allocation15_spill] sm:$0xff]  ;;  %v1063_v16 = vsub.f32 %v2960_v13, %v2261_v63 }
 0x18b   :  { %v1419_v57 = vpop.eup %1418  ;;  %1438 = vpow2.f32 %v1176_v32  ;;  %v1204_v32 = vmul.f32 1.442695, %v1080_v18 }
 0x18c   :  { %v2271_v54 = vpop.eup %1420  ;;  %1440 = vpow2.f32 %v1180_v7  ;;  %v1218_v43 = vadd.f32 %v1407_v30, %v1217_v19  ;;  %v1025_v7 = vsub.f32 %v2950_v31, %v2261_v63  ;;  %v1208_v30 = vmul.f32 1.442695, %v1082_v14 }
 0x18d   :  { %v2275_v61 = vpop.eup %1422  ;;  %1442 = vpow2.f32 %v1184_v22  ;;  %v1027_v19 = vsub.f32 %v1933_v52, %v2261_v63 }
 0x18e   :  { %v2279_v50 = vpop.eup %1424  ;;  %1444 = vpow2.f32 %v1188_v24  ;;  %v1219_v58 = vadd.f32 %v1409_v44, %v1218_v43  ;;  %v1086_v24 = vmul.f32 1.442695, %v1021_v51  ;;  %v1031_v44 = vsub.f32 %v1965_v9, %v2261_v63  ;;  %v2961_v9 = vld [vmem:[#allocation28_spill] sm:$0xff] }
 0x18f   :  { %v2283_v62 = vpop.eup %1426  ;;  %1446 = vpow2.f32 %v1192_v20  ;;  %v1090_v43 = vmul.f32 1.442695, %v1023_v4  ;;  %v1035_v51 = vsub.f32 %v1997_v37, %v2261_v63  ;;  %v1037_v4 = vsub.f32 %v2013_v53, %v2261_v63 }
 0x190   :  { %v2287_v22 = vpop.eup %1428  ;;  %1448 = vpow2.f32 %v1196_v60  ;;  %v1220_v5 = vadd.f32 %v1411_v48, %v1219_v58  ;;  %v1094_v60 = vmul.f32 1.442695, %v1025_v7  ;;  %v1098_v58 = vmul.f32 1.442695, %v1027_v19 }
 0x191   :  { %v2291_v18 = vpop.eup %1430  ;;  %1450 = vpow2.f32 %v1200_v40  ;;  %v1039_v7 = vsub.f32 %v2031_v8, %v2261_v63  ;;  %v1041_v19 = vsub.f32 %v2051_v38, %v2261_v63 }
 0x192   :  { %v2295_v20 = vpop.eup %1432  ;;  %1452 = vpow2.f32 %v1204_v32  ;;  %v1221_v14 = vadd.f32 %v1413_v1, %v1220_v5  ;;  %v1102_v32 = vmul.f32 1.442695, %v1029_v42  ;;  %v1106_v5 = vmul.f32 1.442695, %v1031_v44 }
 0x193   :  { %v2299_v48 = vpop.eup %1434  ;;  %1454 = vpow2.f32 %v1208_v30  ;;  %v1043_v42 = vsub.f32 %v2071_v11, %v2261_v63  ;;  %v1045_v44 = vsub.f32 %v2099_v10, %v2261_v63 }
 0x194   :  { %v2303_v40 = vpop.eup %1436  ;;  %v1222_v41 = vadd.f32 %v1415_v15, %v1221_v14  ;;  %1456 = vpow2.f32 %v1086_v24  ;;  %v1110_v15 = vmul.f32 1.442695, %v1033_v35  ;;  %v1114_v24 = vmul.f32 1.442695, %v1035_v51  ;;  %v2953_v51 = vld [vmem:[#allocation56_spill] sm:$0xff] }
 0x195   :  { %v2307_v1 = vpop.eup %1438  ;;  %1458 = vpow2.f32 %v1090_v43  ;;  %v1047_v35 = vsub.f32 %v2125_v27, %v2261_v63  ;;  %v1122_v43 = vmul.f32 1.442695, %v1039_v7  ;;  %v1049_v11 = vsub.f32 %v2953_v51, %v2261_v63  ;;  %v2957_v51 = vld [vmem:[#allocation16_spill] sm:$0xff] }
 0x196   :  { %v2311_v30 = vpop.eup %1440  ;;  %v1223_v46 = vadd.f32 %v1417_v23, %v1222_v41  ;;  %1460 = vpow2.f32 %v1094_v60  ;;  %v1118_v41 = vmul.f32 1.442695, %v1037_v4  ;;  %v1051_v4 = vsub.f32 %v2170_v25, %v2261_v63 }
 0x197   :  { %v2315_v14 = vpop.eup %1442  ;;  %1462 = vpow2.f32 %v1098_v58  ;;  %v1057_v38 = vsub.f32 %v2957_v51, %v2261_v63  ;;  %v1142_v37 = vmul.f32 1.442695, %v1049_v11  ;;  %v2962_v11 = vld [vmem:[#allocation32_spill] sm:$0xff] }
 0x198   :  { %v2319_v53 = vpop.eup %1444  ;;  %v1224_v8 = vadd.f32 %v1419_v57, %v1223_v46  ;;  %1464 = vpow2.f32 %v1102_v32  ;;  %v1126_v46 = vmul.f32 1.442695, %v1041_v19  ;;  %v1130_v32 = vmul.f32 1.442695, %v1043_v42  ;;  %v2956_v19 = vld [vmem:[#allocation14_spill] sm:$0xff] }
 0x199   :  { %v2323_v23 = vpop.eup %1446  ;;  %1466 = vpow2.f32 %v1106_v5  ;;  %v2954_v5 = vld [vmem:[#allocation13_spill] sm:$0xff]  ;;  %v1146_v12 = vmul.f32 1.442695, %v1051_v4  ;;  %v1067_v6 = vsub.f32 %v2962_v11, %v2261_v63  ;;  %v1158_v4 = vmul.f32 1.442695, %v1057_v38 }
 0x19a   :  { %v2327_v60 = vpop.eup %1448  ;;  %v1225_v58 = vadd.f32 %v2271_v54, %v1224_v8  ;;  %1468 = vpow2.f32 %v1110_v15  ;;  %v1053_v27 = vsub.f32 %v2954_v5, %v2261_v63  ;;  %v1134_v8 = vmul.f32 1.442695, %v1045_v44  ;;  %v2959_v44 = vld [vmem:[#allocation20_spill] sm:$0xff] }
 0x19b   :  { %v2332_v57 = vpop.eup %1450  ;;  %1470 = vpow2.f32 %v1114_v24  ;;  %v1055_v15 = vsub.f32 %v2956_v19, %v2261_v63  ;;  %v1138_v24 = vmul.f32 1.442695, %v1047_v35  ;;  %v1061_v26 = vsub.f32 %v2959_v44, %v2261_v63 }
 0x19c   :  { %v2336_v10 = vpop.eup %1452  ;;  %v1226_v7 = vadd.f32 %v2275_v61, %v1225_v58  ;;  %1472 = vpow2.f32 %v1118_v41  ;;  %v2958_v61 = vld [vmem:[#allocation17_spill] sm:$0xff] }
 0x19d   :  { %v2341_v54 = vpop.eup %1454  ;;  %1474 = vpow2.f32 %v1122_v43  ;;  %v1059_v58 = vsub.f32 %v2958_v61, %v2261_v63  ;;  %v1150_v43 = vmul.f32 1.442695, %v1053_v27  ;;  %v1154_v44 = vmul.f32 1.442695, %v1055_v15 }
 0x19e   :  { %2955 = vst [vmem:[#allocation12_spill] sm:$0xff] %v2341_v54  ;;  %v1457_v42 = vpop.eup %1456  ;;  %v1227_v25 = vadd.f32 %v2279_v50, %v1226_v7  ;;  %1476 = vpow2.f32 %v1126_v46  ;;  %v1065_v46 = vsub.f32 %v2961_v9, %v2261_v63  ;;  %v1166_v15 = vmul.f32 1.442695, %v1061_v26 }
 0x19f   :  { %v1459_v41 = vpop.eup %1458  ;;  %1478 = vpow2.f32 %v1130_v32  ;;  %v1077_v26 = vsub.f32 %v2112_v3, %v2261_v63 }
 0x1a0   :  { %v1461_v54 = vpop.eup %1460  ;;  %v1228_v35 = vadd.f32 %v2283_v62, %v1227_v25  ;;  %1480 = vpow2.f32 %v1134_v8  ;;  %v1249_v50 = vadd.f32 %v1459_v41, %v1457_v42  ;;  %v2963_v25 = vld [vmem:[#allocation36_spill] sm:$0xff]  ;;  %v1162_v42 = vmul.f32 1.442695, %v1059_v58 }
 0x1a1   :  { %v1463_v7 = vpop.eup %1462  ;;  %1482 = vpow2.f32 %v1138_v24  ;;  %v1069_v27 = vsub.f32 %v2963_v25, %v2261_v63  ;;  %v2964_v62 = vld [vmem:[#allocation40_spill] sm:$0xff] }
 0x1a2   :  { %v1465_v2 = vpop.eup %1464  ;;  %v1229_v13 = vadd.f32 %v2287_v22, %v1228_v35  ;;  %1484 = vpow2.f32 %v1142_v37  ;;  %v1250_v32 = vadd.f32 %v1461_v54, %v1249_v50  ;;  %v1071_v8 = vsub.f32 %v2964_v62, %v2261_v63  ;;  %v2965_v37 = vld [vmem:[#allocation44_spill] sm:$0xff] }
 0x1a3   :  { %v1467_v28 = vpop.eup %1466  ;;  %1486 = vpow2.f32 %v1146_v12  ;;  %v1073_v38 = vsub.f32 %v2965_v37, %v2261_v63  ;;  %v2966_v22 = vld [vmem:[#allocation48_spill] sm:$0xff]  ;;  %v1170_v35 = vmul.f32 1.442695, %v1063_v16  ;;  %v1174_v12 = vmul.f32 1.442695, %v1065_v46 }
 0x1a4   :  { %v1469_v41 = vpop.eup %1468  ;;  %v1230_v11 = vadd.f32 %v2291_v18, %v1229_v13  ;;  %1488 = vpow2.f32 %v1150_v43  ;;  %v1251_v24 = vadd.f32 %v1463_v7, %v1250_v32  ;;  %v1075_v54 = vsub.f32 %v2966_v22, %v2261_v63 }
 0x1a5   :  { %v1471_v9 = vpop.eup %1470  ;;  %1490 = vpow2.f32 %v1154_v44  ;;  %v1079_v13 = vsub.f32 %v2128_v56, %v2261_v63  ;;  %v1178_v18 = vmul.f32 1.442695, %v1067_v6  ;;  %v1182_v16 = vmul.f32 1.442695, %v1069_v27 }
 0x1a6   :  { %v1473_v50 = vpop.eup %1472  ;;  %v1231_v62 = vadd.f32 %v2295_v20, %v1230_v11  ;;  %1492 = vpow2.f32 %v1158_v4  ;;  %v1252_v58 = vadd.f32 %v1465_v2, %v1251_v24  ;;  %v1081_v20 = vsub.f32 %v2153_v36, %v2261_v63 }
 0x1a7   :  { %v1475_v25 = vpop.eup %1474  ;;  %1494 = vpow2.f32 %v1162_v42  ;;  %v1083_v2 = vsub.f32 %v2173_v47, %v2261_v63  ;;  %v1186_v46 = vmul.f32 1.442695, %v1071_v8  ;;  %v1190_v6 = vmul.f32 1.442695, %v1073_v38 }
 0x1a8   :  { %v1477_v43 = vpop.eup %1476  ;;  %v1232_v7 = vadd.f32 %v2299_v48, %v1231_v62  ;;  %1496 = vpow2.f32 %v1166_v15  ;;  %v1253_v44 = vadd.f32 %v1467_v28, %v1252_v58  ;;  %v1194_v28 = vmul.f32 1.442695, %v1075_v54 }
 0x1a9   :  { %v1479_v32 = vpop.eup %1478  ;;  %1498 = vpow2.f32 %v1170_v35  ;;  %v1198_v24 = vmul.f32 1.442695, %v1077_v26  ;;  %v1206_v38 = vmul.f32 1.442695, %v1081_v20 }
 0x1aa   :  { %v2379_v11 = vpop.eup %1480  ;;  %v1233_v4 = vadd.f32 %v2303_v40, %v1232_v7  ;;  %1500 = vpow2.f32 %v1174_v12  ;;  %v1254_v42 = vadd.f32 %v1469_v41, %v1253_v44  ;;  %v1202_v41 = vmul.f32 1.442695, %v1079_v13 }
 0x1ab   :  { %v2384_v27 = vpop.eup %1482  ;;  %1502 = vpow2.f32 %v1178_v18 }
 0x1ac   :  { %v2388_v15 = vpop.eup %1484  ;;  %v1234_v8 = vadd.f32 %v2307_v1, %v1233_v4  ;;  %1504 = vpow2.f32 %v1182_v16  ;;  %v1255_v35 = vadd.f32 %v1471_v9, %v1254_v42 }
 0x1ad   :  { %v2391_v40 = vpop.eup %1486  ;;  %1506 = vpow2.f32 %v1186_v46 }
 0x1ae   :  { %v2395_v58 = vpop.eup %1488  ;;  %v1235_v54 = vadd.f32 %v2311_v30, %v1234_v8  ;;  %1508 = vpow2.f32 %v1190_v6  ;;  %v1256_v18 = vadd.f32 %v1473_v50, %v1255_v35 }
 0x1af   :  { %v2402_v9 = vpop.eup %1490  ;;  %1510 = vpow2.f32 %v1194_v28 }
 0x1b0   :  { %v2382_v48 = vpop.xlane.xlu0 %434  ;;  %v2408_v16 = vpop.eup %1492  ;;  %v1236_v30 = vadd.f32 %v2315_v14, %v1235_v54  ;;  %1512 = vpow2.f32 %v1198_v24  ;;  %v1257_v50 = vadd.f32 %v1475_v25, %v1256_v18 }
 0x1b1   :  { %v529_v62 = vsub.f32 %v1884_v21, %v2382_v48  ;;  %v530_v12 = vsub.f32 %v2949_v17, %v2382_v48  ;;  %v1210_v21 = vmul.f32 1.442695, %v1083_v2  ;;  %v2413_v20 = vpop.eup %1494  ;;  %1514 = vpow2.f32 %v1202_v41 }
 0x1b2   :  { %v2417_v4 = vpop.eup %1496  ;;  %1516 = vpow2.f32 %v1206_v38  ;;  %v1258_v6 = vadd.f32 %v1477_v43, %v1257_v50 }
 0x1b3   :  { %v593_v26 = vmul.f32 1.442695, %v529_v62  ;;  %v595_v2 = vmul.f32 1.442695, %v530_v12  ;;  %1518 = vpow2.f32 %v1210_v21 }
 0x1b4   :  { %v2398_v7 = vpop.xlane.xlu1 %485  ;;  %v2400_v1 = vpop.xlane.xlu0 %482  ;;  %v1259_v8 = vadd.f32 %v1479_v32, %v1258_v6 }
 0x1b5   :  { %v563_v13 = vsub.f32 %v1898_v29, %v2398_v7  ;;  %v564_v17 = vsub.f32 %v2956_v19, %v2398_v7  ;;  %v561_v44 = vsub.f32 %v1890_v0, %v2400_v1  ;;  %v562_v29 = vsub.f32 %v2954_v5, %v2400_v1  ;;  %v2424_v0 = vpop.eup %1498 }
 0x1b6   :  { %v1237_v19 = vadd.f32 %v2319_v53, %v1236_v30  ;;  %v2432_v53 = vpop.eup %1500  ;;  %1520 = vpow2.f32 %v593_v26 }
 0x1b7   :  { %v661_v46 = vmul.f32 1.442695, %v563_v13  ;;  %v663_v14 = vmul.f32 1.442695, %v564_v17  ;;  %v657_v24 = vmul.f32 1.442695, %v561_v44  ;;  %v2435_v35 = vpop.eup %1502  ;;  %1522 = vpow2.f32 %v595_v2 }
 0x1b8   :  { %v2420_v42 = vpop.xlane.xlu0 %437  ;;  %v2422_v25 = vpop.xlane.xlu1 %440  ;;  %v1238_v43 = vadd.f32 %v2323_v23, %v1237_v19  ;;  %v659_v41 = vmul.f32 1.442695, %v562_v29 }
 0x1b9   :  { %v531_v28 = vsub.f32 %v1904_v33, %v2420_v42  ;;  %v532_v5 = vsub.f32 %v1907_v34, %v2420_v42  ;;  %v533_v62 = vsub.f32 %v1914_v39, %v2422_v25  ;;  %v534_v33 = vsub.f32 %v2950_v31, %v2422_v25  ;;  %v2439_v12 = vpop.eup %1504 }
 0x1ba   :  { %v1239_v34 = vadd.f32 %v2327_v60, %v1238_v43  ;;  %v1260_v39 = vadd.f32 %v2379_v11, %v1259_v8  ;;  %1524 = vpow2.f32 %v661_v46  ;;  %v2447_v21 = vpop.eup %1506 }
 0x1bb   :  { %v597_v38 = vmul.f32 1.442695, %v531_v28  ;;  %v599_v54 = vmul.f32 1.442695, %v532_v5  ;;  %1526 = vpow2.f32 %v663_v14  ;;  %v601_v18 = vmul.f32 1.442695, %v533_v62  ;;  %v2453_v13 = vpop.eup %1508 }
 0x1bc   :  { %v2443_v23 = vpop.xlane.xlu0 %488  ;;  %v2445_v32 = vpop.xlane.xlu1 %443  ;;  %v1240_v60 = vadd.f32 %v2332_v57, %v1239_v34  ;;  %v1261_v11 = vadd.f32 %v2384_v27, %v1260_v39  ;;  %1528 = vpow2.f32 %v657_v24  ;;  %v603_v50 = vmul.f32 1.442695, %v534_v33  ;;  %v2968_v33 = vld [vmem:[#allocation19_spill] sm:$0xff]  ;;  %v2969_v39 = vld [vmem:[#allocation20_spill] sm:$0xff] }
 0x1bd   :  { %v565_v26 = vsub.f32 %v1922_v45, %v2443_v23  ;;  %v566_v31 = vsub.f32 %v2957_v51, %v2443_v23  ;;  %v535_v17 = vsub.f32 %v1930_v49, %v2445_v32  ;;  %v2459_v30 = vpop.eup %1510  ;;  %1530 = vpow2.f32 %v659_v41 }
 0x1be   :  { %v536_v45 = vsub.f32 %v1933_v52, %v2445_v32  ;;  %v2463_v44 = vpop.eup %1512  ;;  %v1262_v51 = vadd.f32 %v2388_v15, %v1261_v11  ;;  %1532 = vpow2.f32 %v597_v38  ;;  %v1241_v6 = vadd.f32 %v2336_v10, %v1240_v60  ;;  %v2971_v11 = vld [vmem:[#allocation22_spill] sm:$0xff] }
 0x1bf   :  { %v665_v2 = vmul.f32 1.442695, %v565_v26  ;;  %v667_v57 = vmul.f32 1.442695, %v566_v31  ;;  %v2470_v29 = vpop.eup %1514  ;;  %1534 = vpow2.f32 %v599_v54  ;;  %v605_v28 = vmul.f32 1.442695, %v535_v17 }
 0x1c0   :  { %v2466_v46 = vpop.xlane.xlu1 %491  ;;  %v2468_v27 = vpop.xlane.xlu0 %446  ;;  %v1263_v14 = vadd.f32 %v2391_v40, %v1262_v51  ;;  %1536 = vpow2.f32 %v601_v18  ;;  %v607_v62 = vmul.f32 1.442695, %v536_v45  ;;  %v2970_v18 = vld [vmem:[#allocation21_spill] sm:$0xff]  ;;  %v2972_v45 = vld [vmem:[#allocation12_spill] sm:$0xff] }
 0x1c1   :  { %v567_v49 = vsub.f32 %v1938_v55, %v2466_v46  ;;  %v568_v52 = vsub.f32 %v2958_v61, %v2466_v46  ;;  %v537_v19 = vsub.f32 %v1946_v59, %v2468_v27  ;;  %v2478_v15 = vpop.eup %1516  ;;  %1538 = vpow2.f32 %v603_v50  ;;  %v2967_v55 = vld [vmem:[#allocation18_spill] sm:$0xff] }
 0x1c2   :  { %v2482_v5 = vpop.eup %1518  ;;  %v538_v8 = vsub.f32 %v2967_v55, %v2468_v27  ;;  %v1264_v24 = vadd.f32 %v2395_v58, %v1263_v14  ;;  %1540 = vpow2.f32 %v665_v2  ;;  %v2501_v51 = vadd.f32 %v2972_v45, %v1241_v6 }
 0x1c3   :  { %v669_v43 = vmul.f32 1.442695, %v567_v49  ;;  %v1521_v61 = vpop.eup %1520  ;;  %v671_v59 = vmul.f32 1.442695, %v568_v52  ;;  %v609_v41 = vmul.f32 1.442695, %v537_v19  ;;  %1542 = vpow2.f32 %v667_v57 }
 0x1c4   :  { %v2487_v38 = vpop.xlane.xlu0 %494  ;;  %v2489_v10 = vpop.xlane.xlu1 %449  ;;  %v1265_v58 = vadd.f32 %v2402_v9, %v1264_v24  ;;  %1544 = vpow2.f32 %v605_v28  ;;  %v611_v2 = vmul.f32 1.442695, %v538_v8  ;;  %v2975_v24 = vld [vmem:[#allocation25_spill] sm:$0xff] }
 0x1c5   :  { %v1523_v40 = vpop.eup %1522  ;;  %v569_v34 = vsub.f32 %v2968_v33, %v2487_v38  ;;  %v570_v54 = vsub.f32 %v2969_v39, %v2487_v38  ;;  %v539_v26 = vsub.f32 %v2970_v18, %v2489_v10  ;;  %v540_v17 = vsub.f32 %v2971_v11, %v2489_v10 }
 0x1c6   :  { %v1525_v31 = vpop.eup %1524  ;;  %v721_v60 = vadd.f32 %v1523_v40, %v1521_v61  ;;  %1546 = vpow2.f32 %v607_v62  ;;  %v1266_v52 = vadd.f32 %v2408_v16, %v1265_v58  ;;  %v2973_v61 = vld [vmem:[#allocation23_spill] sm:$0xff]  ;;  %v2974_v62 = vld [vmem:[#allocation24_spill] sm:$0xff] }
 0x1c7   :  { %v1527_v50 = vpop.eup %1526  ;;  %v673_v57 = vmul.f32 1.442695, %v569_v34  ;;  %1548 = vpow2.f32 %v669_v43  ;;  %v675_v19 = vmul.f32 1.442695, %v570_v54  ;;  %v613_v14 = vmul.f32 1.442695, %v539_v26 }
 0x1c8   :  { %v1529_v49 = vpop.eup %1528  ;;  %722 = vadd.xlane.f32.xlu0 %v721_v60  ;;  %v2504_v9 = vpop.xlane.xlu1 %497  ;;  %1550 = vpow2.f32 %v671_v59  ;;  %v1267_v43 = vadd.f32 %v2413_v20, %v1266_v52  ;;  %v615_v33 = vmul.f32 1.442695, %v540_v17  ;;  %v2976_v59 = vld [vmem:[#allocation26_spill] sm:$0xff]  ;;  %v772_v26 = vadd.f32 %v1527_v50, %v1525_v31  ;;  %v2978_v52 = vld [vmem:[#allocation28_spill] sm:$0xff] }
 0x1c9   :  { %v2506_v28 = vpop.xlane.xlu0 %452  ;;  %v1531_v55 = vpop.eup %1530  ;;  %v571_v6 = vsub.f32 %v2973_v61, %v2504_v9  ;;  %v572_v8 = vsub.f32 %v2974_v62, %v2504_v9  ;;  %1552 = vpow2.f32 %v609_v41 }
 0x1ca   :  { %v541_v40 = vsub.f32 %v2975_v24, %v2506_v28  ;;  %v1533_v16 = vpop.eup %1532  ;;  %v769_v34 = vadd.f32 %v1531_v55, %v1529_v49  ;;  %1554 = vpow2.f32 %v611_v2  ;;  %v542_v18 = vsub.f32 %v2976_v59, %v2506_v28  ;;  %v2977_v2 = vld [vmem:[#allocation27_spill] sm:$0xff]  ;;  %v2979_v55 = vld [vmem:[#allocation29_spill] sm:$0xff]  ;;  %v2980_v24 = vld [vmem:[#allocation30_spill] sm:$0xff] }
 0x1cb   :  { %v1535_v39 = vpop.eup %1534  ;;  %v677_v54 = vmul.f32 1.442695, %v571_v6  ;;  %v1268_v60 = vadd.f32 %v2417_v4, %v1267_v43  ;;  %1556 = vpow2.f32 %v673_v57  ;;  %v679_v11 = vmul.f32 1.442695, %v572_v8 }
 0x1cc   :  { %v1537_v58 = vpop.eup %1536  ;;  %770 = vadd.xlane.f32.xlu0 %v769_v34  ;;  %v724_v45 = vadd.f32 %v1535_v39, %v1533_v16  ;;  %v2520_v20 = vpop.xlane.xlu1 %455  ;;  %1558 = vpow2.f32 %v675_v19  ;;  %v617_v17 = vmul.f32 1.442695, %v541_v40  ;;  %v619_v8 = vmul.f32 1.442695, %v542_v18 }
 0x1cd   :  { %v2518_v61 = vpop.xlane.xlu0 %500  ;;  %v1539_v41 = vpop.eup %1538  ;;  %v1269_v4 = vadd.f32 %v2424_v0, %v1268_v60  ;;  %1560 = vpow2.f32 %v613_v14  ;;  %v543_v6 = vsub.f32 %v2979_v55, %v2520_v20  ;;  %v544_v40 = vsub.f32 %v2980_v24, %v2520_v20 }
 0x1ce   :  { %v573_v49 = vsub.f32 %v2977_v2, %v2518_v61  ;;  %v574_v31 = vsub.f32 %v2978_v52, %v2518_v61  ;;  %v1541_v50 = vpop.eup %1540  ;;  %v727_v57 = vadd.f32 %v1539_v41, %v1537_v58  ;;  %725 = vadd.xlane.f32.xlu1 %v724_v45  ;;  %1562 = vpow2.f32 %v615_v33  ;;  %v2981_v33 = vld [vmem:[#allocation31_spill] sm:$0xff]  ;;  %v2982_v58 = vld [vmem:[#allocation32_spill] sm:$0xff]  ;;  %v2983_v45 = vld [vmem:[#allocation33_spill] sm:$0xff] }
 0x1cf   :  { %v1543_v62 = vpop.eup %1542  ;;  %v1270_v43 = vadd.f32 %v2432_v53, %v1269_v4  ;;  %1564 = vpow2.f32 %v677_v54  ;;  %v621_v2 = vmul.f32 1.442695, %v543_v6  ;;  %v2985_v6 = vld [vmem:[#allocation35_spill] sm:$0xff] }
 0x1d0   :  { %v681_v19 = vmul.f32 1.442695, %v573_v49  ;;  %v1545_v16 = vpop.eup %1544  ;;  %728 = vadd.xlane.f32.xlu0 %v727_v57  ;;  %v683_v34 = vmul.f32 1.442695, %v574_v31  ;;  %v775_v0 = vadd.f32 %v1543_v62, %v1541_v50  ;;  %v2532_v14 = vpop.xlane.xlu1 %503  ;;  %1566 = vpow2.f32 %v679_v11  ;;  %v2984_v49 = vld [vmem:[#allocation34_spill] sm:$0xff] }
 0x1d1   :  { %v2534_v39 = vpop.xlane.xlu0 %458  ;;  %v1547_v59 = vpop.eup %1546  ;;  %v575_v18 = vsub.f32 %v2981_v33, %v2532_v14  ;;  %v576_v60 = vsub.f32 %v2982_v58, %v2532_v14  ;;  %v1271_v54 = vadd.f32 %v2435_v35, %v1270_v43  ;;  %1568 = vpow2.f32 %v617_v17 }
 0x1d2   :  { %v545_v41 = vsub.f32 %v2983_v45, %v2534_v39  ;;  %v1549_v53 = vpop.eup %1548  ;;  %773 = vadd.xlane.f32.xlu1 %v772_v26  ;;  %v546_v52 = vsub.f32 %v2984_v49, %v2534_v39  ;;  %1570 = vpow2.f32 %v619_v8  ;;  %v623_v11 = vmul.f32 1.442695, %v544_v40  ;;  %v2986_v40 = vld [vmem:[#allocation36_spill] sm:$0xff] }
 0x1d3   :  { %v1551_v31 = vpop.eup %1550  ;;  %v685_v50 = vmul.f32 1.442695, %v575_v18  ;;  %v730_v4 = vadd.f32 %v1547_v59, %v1545_v16  ;;  %v1272_v55 = vadd.f32 %v2439_v12, %v1271_v54  ;;  %1572 = vpow2.f32 %v681_v19 }
 0x1d4   :  { %v1553_v57 = vpop.eup %1552  ;;  %776 = vadd.xlane.f32.xlu0 %v775_v0  ;;  %v687_v62 = vmul.f32 1.442695, %v576_v60  ;;  %v625_v24 = vmul.f32 1.442695, %v545_v41  ;;  %v2548_v35 = vpop.xlane.xlu1 %461  ;;  %1574 = vpow2.f32 %v683_v34  ;;  %v627_v17 = vmul.f32 1.442695, %v546_v52 }
 0x1d5   :  { %v2546_v33 = vpop.xlane.xlu0 %506  ;;  %v1555_v26 = vpop.eup %1554  ;;  %v1273_v12 = vadd.f32 %v2447_v21, %v1272_v55  ;;  %1576 = vpow2.f32 %v621_v2  ;;  %v2987_v0 = vld [vmem:[#allocation37_spill] sm:$0xff]  ;;  %v2988_v34 = vld [vmem:[#allocation38_spill] sm:$0xff]  ;;  %v778_v45 = vadd.f32 %v1551_v31, %v1549_v53  ;;  %v2990_v55 = vld [vmem:[#allocation40_spill] sm:$0xff] }
 0x1d6   :  { %v577_v8 = vsub.f32 %v2985_v6, %v2546_v33  ;;  %v578_v16 = vsub.f32 %v2986_v40, %v2546_v33  ;;  %v1557_v43 = vpop.eup %1556  ;;  %v733_v19 = vadd.f32 %v1555_v26, %v1553_v57  ;;  %731 = vadd.xlane.f32.xlu1 %v730_v4  ;;  %v547_v59 = vsub.f32 %v2987_v0, %v2548_v35  ;;  %v2991_v53 = vld [vmem:[#allocation41_spill] sm:$0xff] }
 0x1d7   :  { %v1559_v18 = vpop.eup %1558  ;;  %1578 = vpow2.f32 %v623_v11  ;;  %v548_v60 = vsub.f32 %v2988_v34, %v2548_v35  ;;  %v1274_v54 = vadd.f32 %v2453_v13, %v1273_v12  ;;  %v2989_v11 = vld [vmem:[#allocation39_spill] sm:$0xff] }
 0x1d8   :  { %v689_v58 = vmul.f32 1.442695, %v577_v8  ;;  %v1561_v41 = vpop.eup %1560  ;;  %1580 = vpow2.f32 %v685_v50  ;;  %734 = vadd.xlane.f32.xlu0 %v733_v19  ;;  %v691_v49 = vmul.f32 1.442695, %v578_v16  ;;  %v781_v21 = vadd.f32 %v1559_v18, %v1557_v43  ;;  %v2560_v2 = vpop.xlane.xlu1 %509  ;;  %v2992_v8 = vld [vmem:[#allocation42_spill] sm:$0xff] }
 0x1d9   :  { %v2562_v52 = vpop.xlane.xlu0 %464  ;;  %v1563_v4 = vpop.eup %1562  ;;  %1582 = vpow2.f32 %v687_v62  ;;  %v579_v57 = vsub.f32 %v2989_v11, %v2560_v2  ;;  %v580_v26 = vsub.f32 %v2990_v55, %v2560_v2  ;;  %v1275_v50 = vadd.f32 %v2459_v30, %v1274_v54  ;;  %v2994_v54 = vld [vmem:[#allocation45_spill] sm:$0xff] }
 0x1da   :  { %v549_v31 = vsub.f32 %v2991_v53, %v2562_v52  ;;  %v1565_v13 = vpop.eup %1564  ;;  %1584 = vpow2.f32 %v625_v24  ;;  %v629_v6 = vmul.f32 1.442695, %v547_v59  ;;  %779 = vadd.xlane.f32.xlu1 %v778_v45  ;;  %v550_v40 = vsub.f32 %v2992_v8, %v2562_v52  ;;  %v2993_v45 = vld [vmem:[#allocation43_spill] sm:$0xff] }
 0x1db   :  { %v1567_v16 = vpop.eup %1566  ;;  %1586 = vpow2.f32 %v627_v17  ;;  %v631_v62 = vmul.f32 1.442695, %v548_v60  ;;  %v693_v43 = vmul.f32 1.442695, %v579_v57  ;;  %v736_v12 = vadd.f32 %v1563_v4, %v1561_v41 }
 0x1dc   :  { %v1569_v19 = vpop.eup %1568  ;;  %v1276_v0 = vadd.f32 %v2463_v44, %v1275_v50  ;;  %1588 = vpow2.f32 %v689_v58  ;;  %782 = vadd.xlane.f32.xlu0 %v781_v21  ;;  %v695_v18 = vmul.f32 1.442695, %v580_v26  ;;  %v633_v34 = vmul.f32 1.442695, %v549_v31  ;;  %v2576_v30 = vpop.xlane.xlu1 %467 }
 0x1dd   :  { %v2574_v11 = vpop.xlane.xlu0 %512  ;;  %v1571_v24 = vpop.eup %1570  ;;  %1590 = vpow2.f32 %v691_v49  ;;  %v635_v59 = vmul.f32 1.442695, %v550_v40  ;;  %v551_v21 = vsub.f32 %v2994_v54, %v2576_v30  ;;  %v2995_v49 = vld [vmem:[#allocation46_spill] sm:$0xff]  ;;  %v784_v26 = vadd.f32 %v1567_v16, %v1565_v13  ;;  %v2996_v40 = vld [vmem:[#allocation47_spill] sm:$0xff]  ;;  %v2997_v13 = vld [vmem:[#allocation49_spill] sm:$0xff] }
 0x1de   :  { %v581_v17 = vsub.f32 %v2993_v45, %v2574_v11  ;;  %v582_v60 = vsub.f32 %v2965_v37, %v2574_v11  ;;  %v1573_v41 = vpop.eup %1572  ;;  %v1277_v44 = vadd.f32 %v2470_v29, %v1276_v0  ;;  %1592 = vpow2.f32 %v629_v6  ;;  %737 = vadd.xlane.f32.xlu1 %v736_v12  ;;  %v2998_v45 = vld [vmem:[#allocation50_spill] sm:$0xff] }
 0x1df   :  { %v739_v58 = vadd.f32 %v1571_v24, %v1569_v19  ;;  %v1575_v4 = vpop.eup %1574  ;;  %1594 = vpow2.f32 %v631_v62  ;;  %v552_v55 = vsub.f32 %v2995_v49, %v2576_v30  ;;  %v637_v19 = vmul.f32 1.442695, %v551_v21 }
 0x1e0   :  { %v697_v57 = vmul.f32 1.442695, %v581_v17  ;;  %v1577_v53 = vpop.eup %1576  ;;  %v1278_v31 = vadd.f32 %v2478_v15, %v1277_v44  ;;  %1596 = vpow2.f32 %v693_v43  ;;  %v699_v37 = vmul.f32 1.442695, %v582_v60  ;;  %v2588_v50 = vpop.xlane.xlu1 %515 }
 0x1e1   :  { %740 = vadd.xlane.f32.xlu0 %v739_v58  ;;  %v787_v29 = vadd.f32 %v1575_v4, %v1573_v41  ;;  %v2590_v6 = vpop.xlane.xlu0 %470  ;;  %v1579_v8 = vpop.eup %1578  ;;  %1598 = vpow2.f32 %v695_v18  ;;  %v583_v62 = vsub.f32 %v2996_v40, %v2588_v50  ;;  %v584_v12 = vsub.f32 %v2966_v22, %v2588_v50 }
 0x1e2   :  { %v553_v16 = vsub.f32 %v2997_v13, %v2590_v6  ;;  %v1581_v15 = vpop.eup %1580  ;;  %v1243_v43 = vrot.slane %v2501_v51, 4  ;;  %1600 = vpow2.f32 %v633_v34  ;;  %785 = vadd.xlane.f32.xlu1 %v784_v26  ;;  %v2600_v24 = vadd.f32 %v2482_v5, %v1278_v31  ;;  %v2999_v5 = vld [vmem:[#allocation51_spill] sm:$0xff] }
 0x1e3   :  { %v1583_v0 = vpop.eup %1582  ;;  %1602 = vpow2.f32 %v635_v59  ;;  %v639_v18 = vmul.f32 1.442695, %v552_v55  ;;  %v554_v17 = vsub.f32 %v2998_v45, %v2590_v6  ;;  %v701_v22 = vmul.f32 1.442695, %v583_v62  ;;  %v3000_v55 = vld [vmem:[#allocation52_spill] sm:$0xff] }
 0x1e4   :  { %v1585_v60 = vpop.eup %1584  ;;  %1604 = vpow2.f32 %v697_v57  ;;  %v703_v41 = vmul.f32 1.442695, %v584_v12  ;;  %v742_v44 = vadd.f32 %v1579_v8, %v1577_v53  ;;  %v2606_v34 = vpop.xlane.xlu1 %473  ;;  %v641_v21 = vmul.f32 1.442695, %v553_v16 }
 0x1e5   :  { %788 = vadd.xlane.f32.xlu0 %v787_v29  ;;  %v2604_v58 = vpop.xlane.xlu0 %518  ;;  %v1587_v54 = vpop.eup %1586  ;;  %1606 = vpow2.f32 %v699_v37  ;;  %v555_v26 = vsub.f32 %v3000_v55, %v2606_v34  ;;  %v1244_v53 = vadd.f32 %v1243_v43, %v2501_v51  ;;  %v643_v29 = vmul.f32 1.442695, %v554_v17  ;;  %v3001_v37 = vld [vmem:[#allocation54_spill] sm:$0xff]  ;;  %v3002_v43 = vld [vmem:[#allocation53_spill] sm:$0xff] }
 0x1e6   :  { %v585_v59 = vsub.f32 %v2999_v5, %v2604_v58  ;;  %v586_v4 = vsub.f32 %v2112_v3, %v2604_v58  ;;  %v1589_v49 = vpop.eup %1588  ;;  %1608 = vpow2.f32 %v637_v19  ;;  %v745_v57 = vadd.f32 %v1587_v54, %v1585_v60  ;;  %743 = vadd.xlane.f32.xlu1 %v742_v44  ;;  %v3003_v60 = vld [vmem:[#allocation55_spill] sm:$0xff] }
 0x1e7   :  { %v1591_v31 = vpop.eup %1590  ;;  %1610 = vpow2.f32 %v639_v18  ;;  %v556_v8 = vsub.f32 %v3001_v37, %v2606_v34  ;;  %v790_v40 = vadd.f32 %v1583_v0, %v1581_v15  ;;  %v1245_v19 = vrot.slane %v1244_v53, 2  ;;  %v3005_v37 = vld [vmem:[#allocation57_spill] sm:$0xff] }
 0x1e8   :  { %v1593_v62 = vpop.eup %1592  ;;  %1612 = vpow2.f32 %v701_v22  ;;  %v705_v3 = vmul.f32 1.442695, %v585_v59  ;;  %v793_v12 = vadd.f32 %v1591_v31, %v1589_v49  ;;  %v2617_v13 = vpop.xlane.xlu1 %521  ;;  %v707_v51 = vmul.f32 1.442695, %v586_v4 }
 0x1e9   :  { %746 = vadd.xlane.f32.xlu0 %v745_v57  ;;  %v2619_v16 = vpop.xlane.xlu0 %476  ;;  %v1595_v45 = vpop.eup %1594  ;;  %1614 = vpow2.f32 %v703_v41  ;;  %v587_v18 = vsub.f32 %v3002_v43, %v2617_v13  ;;  %v588_v17 = vsub.f32 %v2128_v56, %v2617_v13  ;;  %v645_v0 = vmul.f32 1.442695, %v555_v26  ;;  %v3004_v41 = vld [vmem:[#allocation56_spill] sm:$0xff] }
 0x1ea   :  { %v1597_v15 = vpop.eup %1596  ;;  %1616 = vpow2.f32 %v641_v21  ;;  %791 = vadd.xlane.f32.xlu1 %v790_v40  ;;  %v557_v22 = vsub.f32 %v3003_v60, %v2619_v16  ;;  %v1280_v54 = vrot.slane %v2600_v24, 4  ;;  %v647_v5 = vmul.f32 1.442695, %v556_v8 }
 0x1eb   :  { %v1599_v44 = vpop.eup %1598  ;;  %1618 = vpow2.f32 %v643_v29  ;;  %v558_v59 = vsub.f32 %v3004_v41, %v2619_v16  ;;  %v709_v49 = vmul.f32 1.442695, %v587_v18  ;;  %v748_v56 = vadd.f32 %v1595_v45, %v1593_v62  ;;  %v3006_v62 = vld [vmem:[#allocation58_spill] sm:$0xff] }
 0x1ec   :  { %v1601_v4 = vpop.eup %1600  ;;  %1620 = vpow2.f32 %v705_v3  ;;  %v2632_v21 = vpop.xlane.xlu1 %479  ;;  %v1246_v55 = vadd.f32 %v1245_v19, %v1244_v53  ;;  %v711_v31 = vmul.f32 1.442695, %v588_v17  ;;  %v649_v3 = vmul.f32 1.442695, %v557_v22  ;;  %v3007_v19 = vld [vmem:[#allocation60_spill] sm:$0xff] }
 0x1ed   :  { %794 = vadd.xlane.f32.xlu0 %v793_v12  ;;  %v2630_v57 = vpop.xlane.xlu0 %524  ;;  %v1603_v26 = vpop.eup %1602  ;;  %1622 = vpow2.f32 %v707_v51  ;;  %v559_v45 = vsub.f32 %v3006_v62, %v2632_v21  ;;  %v651_v53 = vmul.f32 1.442695, %v558_v59  ;;  %v560_v51 = vsub.f32 %v3007_v19, %v2632_v21 }
 0x1ee   :  { %v589_v29 = vsub.f32 %v3005_v37, %v2630_v57  ;;  %v590_v8 = vsub.f32 %v2153_v36, %v2630_v57  ;;  %v1605_v40 = vpop.eup %1604  ;;  %1624 = vpow2.f32 %v645_v0  ;;  %v751_v12 = vadd.f32 %v1603_v26, %v1601_v4  ;;  %749 = vadd.xlane.f32.xlu1 %v748_v56  ;;  %v3008_v56 = vld [vmem:[#allocation59_spill] sm:$0xff] }
 0x1ef   :  { %v1607_v43 = vpop.eup %1606  ;;  %1626 = vpow2.f32 %v647_v5  ;;  %v796_v18 = vadd.f32 %v1599_v44, %v1597_v15  ;;  %v1281_v0 = vadd.f32 %v1280_v54, %v2600_v24  ;;  %v653_v15 = vmul.f32 1.442695, %v559_v45 }
 0x1f0   :  { %v1609_v17 = vpop.eup %1608  ;;  %1628 = vpow2.f32 %v709_v49  ;;  %v713_v60 = vmul.f32 1.442695, %v589_v29  ;;  %v799_v36 = vadd.f32 %v1607_v43, %v1605_v40  ;;  %v2642_v41 = vpop.xlane.xlu1 %527  ;;  %v715_v4 = vmul.f32 1.442695, %v590_v8 }
 0x1f1   :  { %752 = vadd.xlane.f32.xlu0 %v751_v12  ;;  %v1611_v22 = vpop.eup %1610  ;;  %1630 = vpow2.f32 %v711_v31  ;;  %v591_v5 = vsub.f32 %v3008_v56, %v2642_v41  ;;  %v592_v59 = vsub.f32 %v2173_v47, %v2642_v41  ;;  %v1247_v44 = vrot.slane %v1246_v55, 1 }
 0x1f2   :  { %v1613_v26 = vpop.eup %1612  ;;  %1632 = vpow2.f32 %v649_v3  ;;  %797 = vadd.xlane.f32.xlu1 %v796_v18  ;;  %v1282_v49 = vrot.slane %v1281_v0, 2  ;;  %v655_v29 = vmul.f32 1.442695, %v560_v51  ;;  %v754_v54 = vadd.f32 %v1611_v22, %v1609_v17 }
 0x1f3   :  { %v1615_v37 = vpop.eup %1614  ;;  %1634 = vpow2.f32 %v651_v53  ;;  %v717_v24 = vmul.f32 1.442695, %v591_v5  ;;  %v719_v12 = vmul.f32 1.442695, %v592_v59  ;;  %v1248_v3 = vadd.f32 %v1247_v44, %v1246_v55 }
 0x1f4   :  { %v1617_v40 = vpop.eup %1616  ;;  %1636 = vpow2.f32 %v713_v60  ;;  %v1283_v31 = vadd.f32 %v1282_v49, %v1281_v0  ;;  %v802_v51 = vadd.f32 %v1615_v37, %v1613_v26  ;;  %v1795_v44 = vmov 1966171168  }
 0x1f5   :  { %800 = vadd.xlane.f32.xlu0 %v799_v36  ;;  %v1619_v8 = vpop.eup %1618  ;;  %1638 = vpow2.f32 %v715_v4  ;;  %v1296_v49 = vunpack.c.l.s4 %v1795_v44  ;;  %v1298_v37 = vlaneseq }
 0x1f6   :  { %v1621_v62 = vpop.eup %1620  ;;  %1640 = vpow2.f32 %v653_v15  ;;  %v757_v47 = vadd.f32 %v1619_v8, %v1617_v40  ;;  %755 = vadd.xlane.f32.xlu1 %v754_v54  ;;  %v1284_v45 = vrot.slane %v1283_v31, 1 }
 0x1f7   :  { %v1623_v43 = vpop.eup %1622  ;;  %1642 = vpow2.f32 %v655_v29  ;;  %v1297_v8 = vunpack.c.0.s8 %v1296_v49  ;;  %vm1312_vm0 = vcmp.lt.s32.totalorder %v1298_v37, 256 }
 0x1f8   :  { %v1625_v19 = vpop.eup %1624  ;;  %1644 = vpow2.f32 %v717_v24  ;;  %v805_v53 = vadd.f32 %v1623_v43, %v1621_v62  ;;  %v1285_v18 = vadd.f32 %v1284_v45, %v1283_v31  ;;  %v3009_v45 = vld [vmem:[#allocation61_spill] sm:$0xff] }
 0x1f9   :  { %758 = vadd.xlane.f32.xlu0 %v757_v47  ;;  %v1627_v60 = vpop.eup %1626  ;;  %1646 = vpow2.f32 %v719_v12  ;;  %v1299_v12 = vshrl.u32 %v1298_v37, 7 }
 0x1fa   :  { %v1629_v17 = vpop.eup %1628  ;;  %803 = vadd.xlane.f32.xlu1 %v802_v51  ;;  %1648 = vlog2.f32 %v1248_v3  ;;  %v760_v22 = vadd.f32 %v1627_v60, %v1625_v19 }
 0x1fb   :  { %v1631_v36 = vpop.eup %1630  ;;  %1650 = vlog2.f32 %v1285_v18  ;;  %v1300_v51 = vsub.s32 %v1297_v8, %v1299_v12 }
 0x1fc   :  { %v1633_v0 = vpop.eup %1632  ;;  %v808_v26 = vadd.f32 %v1631_v36, %v1629_v17 }
 0x1fd   :  { %806 = vadd.xlane.f32.xlu0 %v805_v53  ;;  %v1635_v55 = vpop.eup %1634 }
 0x1fe   :  { %v1637_v4 = vpop.eup %1636  ;;  %v763_v56 = vadd.f32 %v1635_v55, %v1633_v0  ;;  %761 = vadd.xlane.f32.xlu1 %v760_v22 }
 0x1ff   :  { %v1639_v5 = vpop.eup %1638 }
 0x200   :  { %v1641_v59 = vpop.eup %1640  ;;  %v811_v15 = vadd.f32 %v1639_v5, %v1637_v4 }
 0x201   :  { %764 = vadd.xlane.f32.xlu0 %v763_v56  ;;  %v1643_v29 = vpop.eup %1642 }
 0x202   :  { %v1645_v40 = vpop.eup %1644  ;;  %809 = vadd.xlane.f32.xlu1 %v808_v26  ;;  %v766_v31 = vadd.f32 %v1643_v29, %v1641_v59 }
 0x203   :  { %v1647_v24 = vpop.eup %1646 }
 0x204   :  { %v1649_v54 = vpop.eup %1648  ;;  %v814_v19 = vadd.f32 %v1647_v24, %v1645_v40 }
 0x205   :  { %812 = vadd.xlane.f32.xlu0 %v811_v15  ;;  %v1651_v62 = vpop.eup %1650  ;;  %v1287_v47 = vmul.f32 0.6931472, %v1649_v54 }
 0x206   :  { %767 = vadd.xlane.f32.xlu1 %v766_v31  ;;  %v1289_v3 = vmul.f32 0.6931472, %v1651_v62 }
 0x207   :  { %v1290_v43 = vadd.f32 %v1287_v47, %v3009_v45 }
 0x208   :  { %v1291_v53 = vadd.f32 %v1289_v3, %v2261_v63 }
 0x20a   :  { %815 = vadd.xlane.f32.xlu1 %v814_v19  ;;  %v1294_v18 = vcombine.low %v1290_v43, %v1291_v53 }
 0x20c   :  { %v1301_v60 = vrot.slane %v1294_v18, %v1300_v51 }
 0x20e   :  { %v1308_v17 = vrot.slane %v1301_v60, %v1300_v51 }
 0x210   :  { %1314 = vst.msk [vmem:[#allocation8] sm:$0x3] %vm1312_vm0, %v1308_v17 }
 0x211   :  { %1771 = shalt.err (!%p1768_p6)
}
 0x212   :  { %s1772_s21 = scalar_lea.hbm %s2827_s4, 32 }
 0x213   :  { %p1773_p7 = scmp.ne.s32.totalorder %s2827_s4, %s1772_s21  ;;  %p1776_p8 = scmp.lt.u32.totalorder %s1772_s21, %s2827_s4 }
 0x215   :  { %p1778_p9 = pnand %p1776_p8, %p1773_p7 }
 0x217   :  { %1781 = shalt.err (!%p1778_p9)
}
 0x218   :  { %1326 = dma.vmem_to_hbm [thread:$0]  %s1324_s17, 32, %s2827_s4, [#allocation5]   ;;  %vm913_vm1 = vcmask 7168  }
 0x255   :  { %v723_v63 = vpop.xlane.xlu0 %722 }
 0x256   :  { %1652 = vlog2.f32 %v723_v63 }
 0x259   :  { %v771_v36 = vpop.xlane.xlu0 %770 }
 0x25a   :  { %1654 = vlog2.f32 %v771_v36 }
 0x25b   :  { %v726_v0 = vpop.xlane.xlu1 %725 }
 0x25c   :  { %1656 = vlog2.f32 %v726_v0 }
 0x25d   :  { %v729_v22 = vpop.xlane.xlu0 %728 }
 0x25e   :  { %1658 = vlog2.f32 %v729_v22 }
 0x25f   :  { %v774_v55 = vpop.xlane.xlu1 %773 }
 0x260   :  { %v1653_v4 = vpop.eup %1652  ;;  %1660 = vlog2.f32 %v774_v55 }
 0x261   :  { %v818_v56 = vmul.f32 0.6931472, %v1653_v4  ;;  %v777_v5 = vpop.xlane.xlu0 %776 }
 0x262   :  { %1662 = vlog2.f32 %v777_v5 }
 0x263   :  { %v881_v59 = vadd.f32 %v818_v56, %v2382_v48  ;;  %v732_v15 = vpop.xlane.xlu1 %731 }
 0x264   :  { %v1655_v26 = vpop.eup %1654  ;;  %1664 = vlog2.f32 %v732_v15 }
 0x265   :  { %914 = vst.msk [vmem:[%s2826_s3] sm:$0xff] %vm913_vm1, %v881_v59  ;;  %v850_v44 = vmul.f32 0.6931472, %v1655_v26  ;;  %v735_v49 = vpop.xlane.xlu0 %734 }
 0x266   :  { %v1657_v37 = vpop.eup %1656  ;;  %1666 = vlog2.f32 %v735_v49 }
 0x267   :  { %v897_v29 = vadd.f32 %v850_v44, %v2400_v1  ;;  %v820_v40 = vmul.f32 0.6931472, %v1657_v37  ;;  %v780_v24 = vpop.xlane.xlu1 %779 }
 0x268   :  { %v1659_v54 = vpop.eup %1658  ;;  %1668 = vlog2.f32 %v780_v24 }
 0x269   :  { %930 = vst.msk [vmem:[%s2826_s3 + $0x80] sm:$0xff] %vm913_vm1, %v897_v29  ;;  %v822_v48 = vmul.f32 0.6931472, %v1659_v54  ;;  %v882_v31 = vadd.f32 %v820_v40, %v2420_v42  ;;  %v783_v8 = vpop.xlane.xlu0 %782 }
 0x26a   :  { %v1661_v12 = vpop.eup %1660  ;;  %1670 = vlog2.f32 %v783_v8 }
 0x26b   :  { %v883_v62 = vadd.f32 %v822_v48, %v2422_v25  ;;  %915 = vst.msk [vmem:[%s2826_s3 + $0x8] sm:$0xff] %vm913_vm1, %v882_v31  ;;  %v852_v1 = vmul.f32 0.6931472, %v1661_v12  ;;  %v738_v47 = vpop.xlane.xlu1 %737 }
 0x26c   :  { %v1663_v3 = vpop.eup %1662  ;;  %1672 = vlog2.f32 %v738_v47 }
 0x26d   :  { %916 = vst.msk [vmem:[%s2826_s3 + $0x10] sm:$0xff] %vm913_vm1, %v883_v62  ;;  %v854_v42 = vmul.f32 0.6931472, %v1663_v3  ;;  %v898_v45 = vadd.f32 %v852_v1, %v2398_v7 }
 0x26e   :  { %v741_v43 = vpop.xlane.xlu0 %740  ;;  %v1665_v19 = vpop.eup %1664 }
 0x26f   :  { %1674 = vlog2.f32 %v741_v43  ;;  %v899_v25 = vadd.f32 %v854_v42, %v2443_v23  ;;  %931 = vst.msk [vmem:[%s2826_s3 + $0x88] sm:$0xff] %vm913_vm1, %v898_v45  ;;  %v824_v53 = vmul.f32 0.6931472, %v1665_v19  ;;  %v786_v51 = vpop.xlane.xlu1 %785 }
 0x270   :  { %v1667_v18 = vpop.eup %1666  ;;  %1676 = vlog2.f32 %v786_v51 }
 0x271   :  { %932 = vst.msk [vmem:[%s2826_s3 + $0x90] sm:$0xff] %vm913_vm1, %v899_v25  ;;  %v826_v7 = vmul.f32 0.6931472, %v1667_v18  ;;  %v884_v60 = vadd.f32 %v824_v53, %v2445_v32 }
 0x272   :  { %v789_v17 = vpop.xlane.xlu0 %788  ;;  %v1669_v63 = vpop.eup %1668 }
 0x273   :  { %1678 = vlog2.f32 %v789_v17  ;;  %v885_v23 = vadd.f32 %v826_v7, %v2468_v27  ;;  %917 = vst.msk [vmem:[%s2826_s3 + $0x18] sm:$0xff] %vm913_vm1, %v884_v60  ;;  %v856_v36 = vmul.f32 0.6931472, %v1669_v63  ;;  %v744_v0 = vpop.xlane.xlu1 %743 }
 0x274   :  { %v1671_v22 = vpop.eup %1670  ;;  %1680 = vlog2.f32 %v744_v0 }
 0x275   :  { %918 = vst.msk [vmem:[%s2826_s3 + $0x20] sm:$0xff] %vm913_vm1, %v885_v23  ;;  %v858_v32 = vmul.f32 0.6931472, %v1671_v22  ;;  %v900_v55 = vadd.f32 %v856_v36, %v2466_v46 }
 0x276   :  { %v747_v4 = vpop.xlane.xlu0 %746  ;;  %v1673_v56 = vpop.eup %1672 }
 0x277   :  { %1682 = vlog2.f32 %v747_v4  ;;  %v901_v27 = vadd.f32 %v858_v32, %v2487_v38  ;;  %933 = vst.msk [vmem:[%s2826_s3 + $0x98] sm:$0xff] %vm913_vm1, %v900_v55  ;;  %v828_v5 = vmul.f32 0.6931472, %v1673_v56  ;;  %v792_v59 = vpop.xlane.xlu1 %791 }
 0x278   :  { %1684 = vlog2.f32 %v792_v59 }
 0x279   :  { %v1675_v15 = vpop.eup %1674  ;;  %934 = vst.msk [vmem:[%s2826_s3 + $0xa0] sm:$0xff] %vm913_vm1, %v901_v27  ;;  %v886_v26 = vadd.f32 %v828_v5, %v2489_v10 }
 0x27a   :  { %v830_v46 = vmul.f32 0.6931472, %v1675_v15  ;;  %v795_v44 = vpop.xlane.xlu0 %794  ;;  %v1677_v49 = vpop.eup %1676 }
 0x27b   :  { %1686 = vlog2.f32 %v795_v44  ;;  %919 = vst.msk [vmem:[%s2826_s3 + $0x28] sm:$0xff] %vm913_vm1, %v886_v26  ;;  %v860_v37 = vmul.f32 0.6931472, %v1677_v49  ;;  %v750_v29 = vpop.xlane.xlu1 %749 }
 0x27c   :  { %v887_v38 = vadd.f32 %v830_v46, %v2506_v28  ;;  %1688 = vlog2.f32 %v750_v29 }
 0x27d   :  { %v1679_v40 = vpop.eup %1678  ;;  %v902_v24 = vadd.f32 %v860_v37, %v2504_v9 }
 0x27e   :  { %920 = vst.msk [vmem:[%s2826_s3 + $0x30] sm:$0xff] %vm913_vm1, %v887_v38  ;;  %v862_v10 = vmul.f32 0.6931472, %v1679_v40  ;;  %v753_v54 = vpop.xlane.xlu0 %752  ;;  %v1681_v48 = vpop.eup %1680 }
 0x27f   :  { %1690 = vlog2.f32 %v753_v54  ;;  %935 = vst.msk [vmem:[%s2826_s3 + $0xa8] sm:$0xff] %vm913_vm1, %v902_v24  ;;  %v832_v31 = vmul.f32 0.6931472, %v1681_v48  ;;  %v798_v8 = vpop.xlane.xlu1 %797 }
 0x280   :  { %v903_v28 = vadd.f32 %v862_v10, %v2518_v61  ;;  %1692 = vlog2.f32 %v798_v8 }
 0x281   :  { %v1683_v12 = vpop.eup %1682  ;;  %v888_v62 = vadd.f32 %v832_v31, %v2520_v20 }
 0x282   :  { %936 = vst.msk [vmem:[%s2826_s3 + $0xb0] sm:$0xff] %vm913_vm1, %v903_v28  ;;  %v834_v9 = vmul.f32 0.6931472, %v1683_v12  ;;  %v801_v1 = vpop.xlane.xlu0 %800  ;;  %v1685_v47 = vpop.eup %1684 }
 0x283   :  { %1694 = vlog2.f32 %v801_v1  ;;  %921 = vst.msk [vmem:[%s2826_s3 + $0x38] sm:$0xff] %vm913_vm1, %v888_v62  ;;  %v864_v3 = vmul.f32 0.6931472, %v1685_v47  ;;  %v756_v42 = vpop.xlane.xlu1 %755 }
 0x284   :  { %v889_v61 = vadd.f32 %v834_v9, %v2534_v39  ;;  %1696 = vlog2.f32 %v756_v42 }
 0x285   :  { %v1687_v45 = vpop.eup %1686  ;;  %v904_v43 = vadd.f32 %v864_v3, %v2532_v14 }
 0x286   :  { %922 = vst.msk [vmem:[%s2826_s3 + $0x40] sm:$0xff] %vm913_vm1, %v889_v61  ;;  %v866_v20 = vmul.f32 0.6931472, %v1687_v45  ;;  %v759_v19 = vpop.xlane.xlu0 %758  ;;  %v1689_v25 = vpop.eup %1688 }
 0x287   :  { %1698 = vlog2.f32 %v759_v19  ;;  %937 = vst.msk [vmem:[%s2826_s3 + $0xb8] sm:$0xff] %vm913_vm1, %v904_v43  ;;  %v836_v53 = vmul.f32 0.6931472, %v1689_v25  ;;  %v804_v51 = vpop.xlane.xlu1 %803 }
 0x288   :  { %v905_v39 = vadd.f32 %v866_v20, %v2546_v33  ;;  %1700 = vlog2.f32 %v804_v51 }
 0x289   :  { %v1691_v18 = vpop.eup %1690  ;;  %v890_v7 = vadd.f32 %v836_v53, %v2548_v35 }
 0x28a   :  { %938 = vst.msk [vmem:[%s2826_s3 + $0xc0] sm:$0xff] %vm913_vm1, %v905_v39  ;;  %v838_v14 = vmul.f32 0.6931472, %v1691_v18  ;;  %v807_v60 = vpop.xlane.xlu0 %806  ;;  %v1693_v17 = vpop.eup %1692 }
 0x28b   :  { %1702 = vlog2.f32 %v807_v60  ;;  %923 = vst.msk [vmem:[%s2826_s3 + $0x48] sm:$0xff] %vm913_vm1, %v890_v7  ;;  %v868_v63 = vmul.f32 0.6931472, %v1693_v17  ;;  %v762_v23 = vpop.xlane.xlu1 %761 }
 0x28c   :  { %v891_v33 = vadd.f32 %v838_v14, %v2562_v52  ;;  %1704 = vlog2.f32 %v762_v23 }
 0x28d   :  { %v1695_v36 = vpop.eup %1694  ;;  %v906_v0 = vadd.f32 %v868_v63, %v2560_v2 }
 0x28e   :  { %924 = vst.msk [vmem:[%s2826_s3 + $0x50] sm:$0xff] %vm913_vm1, %v891_v33  ;;  %v870_v35 = vmul.f32 0.6931472, %v1695_v36  ;;  %v765_v22 = vpop.xlane.xlu0 %764  ;;  %v1697_v32 = vpop.eup %1696 }
 0x28f   :  { %1706 = vlog2.f32 %v765_v22  ;;  %939 = vst.msk [vmem:[%s2826_s3 + $0xc8] sm:$0xff] %vm913_vm1, %v906_v0  ;;  %v840_v55 = vmul.f32 0.6931472, %v1697_v32  ;;  %v810_v4 = vpop.xlane.xlu1 %809 }
 0x290   :  { %v907_v52 = vadd.f32 %v870_v35, %v2574_v11  ;;  %1708 = vlog2.f32 %v810_v4 }
 0x291   :  { %v1699_v56 = vpop.eup %1698  ;;  %v892_v27 = vadd.f32 %v840_v55, %v2576_v30 }
 0x292   :  { %940 = vst.msk [vmem:[%s2826_s3 + $0xd0] sm:$0xff] %vm913_vm1, %v907_v52  ;;  %v842_v2 = vmul.f32 0.6931472, %v1699_v56  ;;  %v813_v5 = vpop.xlane.xlu0 %812  ;;  %v1701_v59 = vpop.eup %1700 }
 0x293   :  { %1710 = vlog2.f32 %v813_v5  ;;  %925 = vst.msk [vmem:[%s2826_s3 + $0x58] sm:$0xff] %vm913_vm1, %v892_v27  ;;  %v872_v15 = vmul.f32 0.6931472, %v1701_v59  ;;  %v768_v46 = vpop.xlane.xlu1 %767 }
 0x294   :  { %v893_v11 = vadd.f32 %v842_v2, %v2590_v6  ;;  %1712 = vlog2.f32 %v768_v46 }
 0x295   :  { %v1703_v26 = vpop.eup %1702  ;;  %v908_v44 = vadd.f32 %v872_v15, %v2588_v50 }
 0x296   :  { %926 = vst.msk [vmem:[%s2826_s3 + $0x60] sm:$0xff] %vm913_vm1, %v893_v11  ;;  %v874_v30 = vmul.f32 0.6931472, %v1703_v26  ;;  %v1705_v49 = vpop.eup %1704 }
 0x297   :  { %941 = vst.msk [vmem:[%s2826_s3 + $0xd8] sm:$0xff] %vm913_vm1, %v908_v44  ;;  %v844_v38 = vmul.f32 0.6931472, %v1705_v49  ;;  %v816_v37 = vpop.xlane.xlu1 %815 }
 0x298   :  { %v909_v6 = vadd.f32 %v874_v30, %v2604_v58  ;;  %1714 = vlog2.f32 %v816_v37 }
 0x299   :  { %v1707_v29 = vpop.eup %1706  ;;  %v894_v50 = vadd.f32 %v844_v38, %v2606_v34 }
 0x29a   :  { %942 = vst.msk [vmem:[%s2826_s3 + $0xe0] sm:$0xff] %vm913_vm1, %v909_v6  ;;  %v846_v40 = vmul.f32 0.6931472, %v1707_v29  ;;  %v1709_v10 = vpop.eup %1708 }
 0x29b   :  { %927 = vst.msk [vmem:[%s2826_s3 + $0x68] sm:$0xff] %vm913_vm1, %v894_v50  ;;  %v876_v24 = vmul.f32 0.6931472, %v1709_v10 }
 0x29c   :  { %v895_v58 = vadd.f32 %v846_v40, %v2619_v16 }
 0x29d   :  { %v1711_v54 = vpop.eup %1710  ;;  %v910_v28 = vadd.f32 %v876_v24, %v2617_v13 }
 0x29e   :  { %928 = vst.msk [vmem:[%s2826_s3 + $0x70] sm:$0xff] %vm913_vm1, %v895_v58  ;;  %v878_v48 = vmul.f32 0.6931472, %v1711_v54  ;;  %v1713_v31 = vpop.eup %1712 }
 0x29f   :  { %943 = vst.msk [vmem:[%s2826_s3 + $0xe8] sm:$0xff] %vm913_vm1, %v910_v28  ;;  %v848_v16 = vmul.f32 0.6931472, %v1713_v31 }
 0x2a0   :  { %v911_v34 = vadd.f32 %v878_v48, %v2630_v57 }
 0x2a1   :  { %v896_v8 = vadd.f32 %v848_v16, %v2632_v21 }
 0x2a2   :  { %944 = vst.msk [vmem:[%s2826_s3 + $0xf0] sm:$0xff] %vm913_vm1, %v911_v34  ;;  %v1715_v12 = vpop.eup %1714 }
 0x2a3   :  { %929 = vst.msk [vmem:[%s2826_s3 + $0x78] sm:$0xff] %vm913_vm1, %v896_v8  ;;  %v880_v13 = vmul.f32 0.6931472, %v1715_v12 }
 0x2a5   :  { %v912_v57 = vadd.f32 %v880_v13, %v2642_v41 }
 0x2a7   :  { %945 = vst.msk [vmem:[%s2826_s3 + $0xf8] sm:$0xff] %vm913_vm1, %v912_v57 }
 0x2a8   :  { %1786 = dma.done.wait [#allocation5], 32  }
 0x2a9   :  { %1787 = vsyncadd [#allocation5], 4294967264 }
 0x2aa   :  { %1332 = vsyncpa [#allocation4], 1 }
 0x2ab   :  { %1333 = vsyncpa [#allocation7], 1 }
 0x2ac   :  { %1334 = vsyncpa [#allocation5], 1 }

</bundles_post_ra>
